<compile_context>
chip_gen: v5e
topology: v5e:2x2
jax: 0.10.0
libtpu: 0.0.40
codegen_flags: <defaults>
</compile_context>

<pallas_src>
import functools
import math

import jax
import jax.numpy as jnp
from jax.experimental import pallas as pl
from jax.experimental.pallas import tpu as pltpu


# ----------------------------------------------------------------------------
# Fused kernel: one (batch-block, layer) grid step.
# ----------------------------------------------------------------------------
def _layer_norm(x, gamma, beta, eps=1e-5):
    mu = jnp.mean(x, axis=-1, keepdims=True)
    var = jnp.mean((x - mu) ** 2, axis=-1, keepdims=True)
    return (x - mu) * jax.lax.rsqrt(var + eps) * gamma + beta


def _fused_encoder_kernel(
    num_heads, dim_k,
    x_ref,                      # (Bb, S, D)   input block (used at l == 0)
    pe_ref,                     # (S, D)       positional encoding
    wqkv_ref, bqkv_ref,         # (1, D, 3*H*Dk), (1, 1, 3*H*Dk)   (Q scale pre-folded)
    wo_ref, bo_ref,             # (1, H*Dk, D), (1, 1, D)
    ln1_g_ref, ln1_b_ref,       # (1, 1, D), (1, 1, D)
    w1_ref, b1_ref,             # (1, D, F), (1, 1, F)
    w2_ref, b2_ref,             # (1, F, D), (1, 1, D)
    ln2_g_ref, ln2_b_ref,       # (1, 1, D), (1, 1, D)
    o_ref,                      # (Bb, S, D)   output block (written at l == L-1)
    act_ref,                    # VMEM scratch (Bb*S, D): activation carried across layers
):
    bb, seq, dim = x_ref.shape
    rows = bb * seq
    hdk = num_heads * dim_k
    l = pl.program_id(1)

    # Layer 0: load input block, add positional encoding, flatten batch into rows.
    @pl.when(l == 0)
    def _():
        act_ref[...] = (x_ref[...] + pe_ref[...]).reshape(rows, dim)

    x = act_ref[...]                                                  # (rows, D)

    # ---- fused QKV projection: one lane-dense MXU matmul --------------------
    qkv = jnp.dot(x, wqkv_ref[0], preferred_element_type=jnp.float32) + bqkv_ref[0]

    # ---- per-head scaled dot-product attention (scores stay per batch/head) -
    ctx_parts = []
    for h in range(num_heads):                                        # H is small & static
        q = qkv[:, h * dim_k:(h + 1) * dim_k].reshape(bb, seq, dim_k)
        k = qkv[:, hdk + h * dim_k: hdk + (h + 1) * dim_k].reshape(bb, seq, dim_k)
        v = qkv[:, 2 * hdk + h * dim_k: 2 * hdk + (h + 1) * dim_k].reshape(bb, seq, dim_k)
        s = jnp.einsum('bqd,bkd->bqk', q, k, preferred_element_type=jnp.float32)
        s = s - jnp.max(s, axis=-1, keepdims=True)
        p = jnp.exp(s)
        p = p * pl.reciprocal(jnp.sum(p, axis=-1, keepdims=True), approx=True)
        c = jnp.einsum('bqk,bkd->bqd', p, v, preferred_element_type=jnp.float32)
        ctx_parts.append(c.reshape(rows, dim_k))
    ctx = jnp.concatenate(ctx_parts, axis=-1)                         # (rows, H*Dk)

    # ---- output projection: single matmul (MXU accumulates over heads) ------
    attn = jnp.dot(ctx, wo_ref[0], preferred_element_type=jnp.float32) + bo_ref[0]

    # ---- residual + layernorm 1 (dropout = identity in eval) ----------------
    y = _layer_norm(x + attn, ln1_g_ref[0], ln1_b_ref[0])

    # ---- feed-forward (batch folded into M for both matmuls) ----------------
    h1 = jnp.dot(y, w1_ref[0], preferred_element_type=jnp.float32) + b1_ref[0]
    h1 = jnp.maximum(h1, 0.0)
    ff = jnp.dot(h1, w2_ref[0], preferred_element_type=jnp.float32) + b2_ref[0]

    # ---- residual + layernorm 2 ----------------------------------------------
    z = _layer_norm(y + ff, ln2_g_ref[0], ln2_b_ref[0])

    act_ref[...] = z

    @pl.when(l == pl.num_programs(1) - 1)
    def _():
        o_ref[...] = z.reshape(bb, seq, dim)


# ----------------------------------------------------------------------------
# Positional encoding (matches the PyTorch reference).
# ----------------------------------------------------------------------------
def position_encoding(seq_len, dim_model):
    pos = jnp.arange(seq_len, dtype=jnp.float32).reshape(1, -1, 1)
    dim = jnp.arange(dim_model, dtype=jnp.float32).reshape(1, 1, -1)
    phase = pos / (1e4 ** (dim / dim_model))
    even = (jnp.arange(dim_model).reshape(1, 1, -1) % 2) == 0
    return jnp.where(even, jnp.sin(phase), jnp.cos(phase))


def _pick_block_b(batch, seq, target_rows=256):
    # Largest divisor of batch with block_b * seq <= target_rows (fill the MXU M dim).
    # TODO(synk): on v7x with batch == 1, split rows/heads instead to use both TCs.
    best = 1
    for cand in range(1, batch + 1):
        if batch % cand == 0 and cand * seq <= target_rows:
            best = cand
    return best


# ----------------------------------------------------------------------------
# Wrapper: fold/stack weights, build layer-streaming specs, single pallas_call.
# ----------------------------------------------------------------------------
def encoder_forward_pallas(src, params):
    B, S, D = src.shape
    L = len(params)
    H = params[0]["wq"].shape[0]
    Dk = params[0]["wq"].shape[2]
    HDk = H * Dk
    F = params[0]["w1"].shape[1]
    scale = 1.0 / math.sqrt(float(Dk))

    # --- pack per-layer weights: fused QKV slab, lane-aligned biases --------
    def fuse_qkv_w(p):
        wq = jnp.transpose(p["wq"] * scale, (1, 0, 2)).reshape(D, HDk)
        wk = jnp.transpose(p["wk"], (1, 0, 2)).reshape(D, HDk)
        wv = jnp.transpose(p["wv"], (1, 0, 2)).reshape(D, HDk)
        return jnp.concatenate([wq, wk, wv], axis=-1)                 # (D, 3*H*Dk)

    def fuse_qkv_b(p):
        return jnp.concatenate([(p["bq"] * scale).reshape(HDk),
                                p["bk"].reshape(HDk),
                                p["bv"].reshape(HDk)])[None, :]       # (1, 3*H*Dk)

    weights = {
        "wqkv":  jnp.stack([fuse_qkv_w(p) for p in params]),          # (L, D, 3HDk)
        "bqkv":  jnp.stack([fuse_qkv_b(p) for p in params]),          # (L, 1, 3HDk)
        "wo":    jnp.stack([p["wo"] for p in params]),                # (L, HDk, D)
        "bo":    jnp.stack([p["bo"][None, :] for p in params]),       # (L, 1, D)
        "ln1_g": jnp.stack([p["ln1_g"][None, :] for p in params]),    # (L, 1, D)
        "ln1_b": jnp.stack([p["ln1_b"][None, :] for p in params]),
        "w1":    jnp.stack([p["w1"] for p in params]),                # (L, D, F)
        "b1":    jnp.stack([p["b1"][None, :] for p in params]),       # (L, 1, F)
        "w2":    jnp.stack([p["w2"] for p in params]),                # (L, F, D)
        "b2":    jnp.stack([p["b2"][None, :] for p in params]),       # (L, 1, D)
        "ln2_g": jnp.stack([p["ln2_g"][None, :] for p in params]),
        "ln2_b": jnp.stack([p["ln2_b"][None, :] for p in params]),
    }
    order = ["wqkv", "bqkv", "wo", "bo", "ln1_g", "ln1_b",
             "w1", "b1", "w2", "b2", "ln2_g", "ln2_b"]
    weight_list = [weights[k] for k in order]

    pe = position_encoding(S, D)[0]                                   # (S, D)

    Bb = _pick_block_b(B, S)
    nb = B // Bb

    # Per-layer weight streaming: block of 1 layer, indexed by the l grid axis.
    def layer_spec(arr):
        blk = (1,) + arr.shape[1:]
        zeros = (0,) * (arr.ndim - 1)
        return pl.BlockSpec(blk, lambda b, l, _z=zeros: (l,) + _z)

    in_specs = ([pl.BlockSpec((Bb, S, D), lambda b, l: (b, 0, 0)),
                 pl.BlockSpec((S, D), lambda b, l: (0, 0))]
                + [layer_spec(a) for a in weight_list])
    out_spec = pl.BlockSpec((Bb, S, D), lambda b, l: (b, 0, 0))

    # VMEM budget: ~2 layers of streamed weights + activation blocks + score headroom.
    per_layer_w_bytes = sum(int(a.nbytes) for a in weight_list) // L
    act_bytes = 4 * Bb * S * D
    transient = 4 * Bb * S * (3 * HDk + F + 2 * S)
    budget = 2 * per_layer_w_bytes + 8 * act_bytes + transient + (8 << 20)
    vmem_limit = int(max(32 << 20, min(budget, 64 << 20)))

    kernel = functools.partial(_fused_encoder_kernel, H, Dk)
    return pl.pallas_call(
        kernel,
        out_shape=jax.ShapeDtypeStruct((B, S, D), jnp.float32),
        grid=(nb, L),
        in_specs=in_specs,
        out_specs=out_spec,
        scratch_shapes=[pltpu.VMEM((Bb * S, D), jnp.float32)],
        compiler_params=pltpu.CompilerParams(
            dimension_semantics=("parallel", "arbitrary"),
            vmem_limit_bytes=vmem_limit),
    )(src, pe, *weight_list)


# ----------------------------------------------------------------------------
# Pure-jnp reference (same math as the PyTorch module) for a correctness check.
# ----------------------------------------------------------------------------
def encoder_forward_ref(src, params):
    seq_len, dim = src.shape[1], src.shape[2]
    x = src + position_encoding(seq_len, dim)
    for p in params:
        heads = []
        H = p["wq"].shape[0]
        dk = p["wq"].shape[2]
        for h in range(H):
            q = x @ p["wq"][h] + p["bq"][h]
            k = x @ p["wk"][h] + p["bk"][h]
            v = x @ p["wv"][h] + p["bv"][h]
            s = jnp.einsum("bqd,bkd->bqk", q, k) / jnp.sqrt(jnp.float32(dk))
            a = jax.nn.softmax(s, axis=-1)
            heads.append(jnp.einsum("bqk,bkd->bqd", a, v))
        attn = jnp.concatenate(heads, axis=-1) @ p["wo"] + p["bo"]
        y = x + attn
        mu = jnp.mean(y, -1, keepdims=True)
        var = jnp.mean((y - mu) ** 2, -1, keepdims=True)
        y = (y - mu) / jnp.sqrt(var + 1e-5) * p["ln1_g"] + p["ln1_b"]
        ff = jnp.maximum(y @ p["w1"] + p["b1"], 0.0) @ p["w2"] + p["b2"]
        z = y + ff
        mu2 = jnp.mean(z, -1, keepdims=True)
        var2 = jnp.mean((z - mu2) ** 2, -1, keepdims=True)
        x = (z - mu2) / jnp.sqrt(var2 + 1e-5) * p["ln2_g"] + p["ln2_b"]
    return x


# ----------------------------------------------------------------------------
# Deterministic synthetic parameters (no checkpoint).
# ----------------------------------------------------------------------------
def make_params(key, num_layers, dim_model, num_heads, dim_feedforward):
    dim_k = max(dim_model // num_heads, 1)
    params = []
    for _ in range(num_layers):
        key, *ks = jax.random.split(key, 9)

        def init(k, shape, fan_in):
            return (jax.random.normal(k, shape, jnp.float32) / math.sqrt(fan_in)).astype(jnp.float32)

        p = {
            "wq": init(ks[0], (num_heads, dim_model, dim_k), dim_model),
            "bq": jnp.zeros((num_heads, dim_k), jnp.float32),
            "wk": init(ks[1], (num_heads, dim_model, dim_k), dim_model),
            "bk": jnp.zeros((num_heads, dim_k), jnp.float32),
            "wv": init(ks[2], (num_heads, dim_model, dim_k), dim_model),
            "bv": jnp.zeros((num_heads, dim_k), jnp.float32),
            "wo": init(ks[3], (num_heads * dim_k, dim_model), num_heads * dim_k),
            "bo": init(ks[4], (dim_model,), dim_model),
            "ln1_g": jnp.ones((dim_model,), jnp.float32),
            "ln1_b": jnp.zeros((dim_model,), jnp.float32),
            "w1": init(ks[5], (dim_model, dim_feedforward), dim_model),
            "b1": init(ks[6], (dim_feedforward,), dim_model),
            "w2": init(ks[7], (dim_feedforward, dim_model), dim_feedforward),
            "b2": jnp.zeros((dim_model,), jnp.float32),
            "ln2_g": jnp.ones((dim_model,), jnp.float32),
            "ln2_b": jnp.zeros((dim_model,), jnp.float32),
        }
        params.append(p)
    return params


if __name__ == "__main__":
    # Small shapes consistent with the module: (batch, seq_len, dim_model)
    B, S, D = 2, 8, 32
    NUM_LAYERS, NUM_HEADS, DIM_FF = 2, 4, 64

    key = jax.random.PRNGKey(0)
    key, xk = jax.random.split(key)
    src = jax.random.normal(xk, (B, S, D), jnp.float32)
    params = make_params(key, NUM_LAYERS, D, NUM_HEADS, DIM_FF)

    out = encoder_forward_pallas(src, params)
    out = jax.block_until_ready(out)

    ref = encoder_forward_ref(src, params)
    assert out.shape == (B, S, D)
    assert bool(jnp.all(jnp.isfinite(out)))
    assert bool(jnp.allclose(out, ref, rtol=1e-2, atol=1e-2)), "mismatch vs reference"

    print("KERNEL_OK")
</pallas_src>

<mosaic_0001>
module attributes {stable_mosaic.version = 11 : i64} {
  func.func @_fused_encoder_kernel(%arg0: i32, %arg1: i32, %arg2: memref<2x8x32xf32, #tpu.memory_space<vmem>>, %arg3: memref<8x32xf32, #tpu.memory_space<vmem>>, %arg4: memref<1x32x96xf32, #tpu.memory_space<vmem>>, %arg5: memref<1x1x96xf32, #tpu.memory_space<vmem>>, %arg6: memref<1x32x32xf32, #tpu.memory_space<vmem>>, %arg7: memref<1x1x32xf32, #tpu.memory_space<vmem>>, %arg8: memref<1x1x32xf32, #tpu.memory_space<vmem>>, %arg9: memref<1x1x32xf32, #tpu.memory_space<vmem>>, %arg10: memref<1x32x64xf32, #tpu.memory_space<vmem>>, %arg11: memref<1x1x64xf32, #tpu.memory_space<vmem>>, %arg12: memref<1x64x32xf32, #tpu.memory_space<vmem>>, %arg13: memref<1x1x32xf32, #tpu.memory_space<vmem>>, %arg14: memref<1x1x32xf32, #tpu.memory_space<vmem>>, %arg15: memref<1x1x32xf32, #tpu.memory_space<vmem>>, %arg16: memref<2x8x32xf32, #tpu.memory_space<vmem>>, %arg17: memref<16x32xf32, #tpu.memory_space<vmem>>) attributes {dimension_semantics = [#tpu.dimension_semantics<parallel>, #tpu.dimension_semantics<arbitrary>], iteration_bounds = array<i64: 1, 2>, scalar_prefetch = 0 : i64, scratch_operands = 1 : i64, tpu.core_type = #tpu.core_type<tc>, window_params = [{transform_indices = @transform_0, window_bounds = array<i64: 2, 8, 32>}, {pipeline_mode = #tpu.pipeline_mode<synchronous>, transform_indices = @transform_1, window_bounds = array<i64: 8, 32>}, {transform_indices = @transform_2, window_bounds = array<i64: 1, 32, 96>}, {transform_indices = @transform_3, window_bounds = array<i64: 1, 1, 96>}, {transform_indices = @transform_4, window_bounds = array<i64: 1, 32, 32>}, {transform_indices = @transform_5, window_bounds = array<i64: 1, 1, 32>}, {transform_indices = @transform_6, window_bounds = array<i64: 1, 1, 32>}, {transform_indices = @transform_7, window_bounds = array<i64: 1, 1, 32>}, {transform_indices = @transform_8, window_bounds = array<i64: 1, 32, 64>}, {transform_indices = @transform_9, window_bounds = array<i64: 1, 1, 64>}, {transform_indices = @transform_10, window_bounds = array<i64: 1, 64, 32>}, {transform_indices = @transform_11, window_bounds = array<i64: 1, 1, 32>}, {transform_indices = @transform_12, window_bounds = array<i64: 1, 1, 32>}, {transform_indices = @transform_13, window_bounds = array<i64: 1, 1, 32>}, {transform_indices = @transform_14, window_bounds = array<i64: 2, 8, 32>}]} {
    %c0_i32 = arith.constant 0 : i32
    %0 = arith.cmpi eq, %arg1, %c0_i32 : i32
    %1 = arith.extui %0 : i1 to i32
    %c0_i32_0 = arith.constant 0 : i32
    %2 = arith.cmpi ne, %1, %c0_i32_0 : i32
    scf.if %2 {
      %c0_71 = arith.constant 0 : index
      %c0_72 = arith.constant 0 : index
      %c0_73 = arith.constant 0 : index
      %169 = vector.load %arg2[%c0_71, %c0_72, %c0_73] : memref<2x8x32xf32, #tpu.memory_space<vmem>>, vector<2x8x32xf32>
      %c0_74 = arith.constant 0 : index
      %c0_75 = arith.constant 0 : index
      %170 = vector.load %arg3[%c0_74, %c0_75] : memref<8x32xf32, #tpu.memory_space<vmem>>, vector<8x32xf32>
      %171 = vector.shape_cast %170 : vector<8x32xf32> to vector<1x8x32xf32>
      %172 = vector.broadcast %171 : vector<1x8x32xf32> to vector<2x8x32xf32>
      %173 = arith.addf %169, %172 : vector<2x8x32xf32>
      %174 = vector.shape_cast %173 : vector<2x8x32xf32> to vector<16x32xf32>
      %c0_76 = arith.constant 0 : index
      %c0_77 = arith.constant 0 : index
      %175 = vector.load %arg17[%c0_76, %c0_77] : memref<16x32xf32, #tpu.memory_space<vmem>>, vector<16x32xf32>
      tpu.vector_store %arg17[%c0_76, %c0_77], %174 {strides = array<i32>} : memref<16x32xf32, #tpu.memory_space<vmem>>, vector<16x32xf32>,
    } else {
    }
    %c0 = arith.constant 0 : index
    %c0_1 = arith.constant 0 : index
    %3 = vector.load %arg17[%c0, %c0_1] : memref<16x32xf32, #tpu.memory_space<vmem>>, vector<16x32xf32>
    %c0_2 = arith.constant 0 : index
    %c0_3 = arith.constant 0 : index
    %c0_4 = arith.constant 0 : index
    %4 = vector.load %arg4[%c0_2, %c0_3, %c0_4] : memref<1x32x96xf32, #tpu.memory_space<vmem>>, vector<1x32x96xf32>
    %5 = vector.shape_cast %4 : vector<1x32x96xf32> to vector<32x96xf32>
    %cst = arith.constant dense<0.000000e+00> : vector<16x96xf32>
    %6 = tpu.matmul %3, %5, %cst {dimension_numbers = #tpu.dot_dimension_numbers<[1], [0], [0], [1], [0, 0, 1, 1], [], []>} : vector<16x32xf32>, vector<32x96xf32>, vector<16x96xf32> -> vector<16x96xf32>
    %c0_5 = arith.constant 0 : index
    %c0_6 = arith.constant 0 : index
    %c0_7 = arith.constant 0 : index
    %7 = vector.load %arg5[%c0_5, %c0_6, %c0_7] : memref<1x1x96xf32, #tpu.memory_space<vmem>>, vector<1x1x96xf32>
    %8 = vector.shape_cast %7 : vector<1x1x96xf32> to vector<1x96xf32>
    %9 = vector.broadcast %8 : vector<1x96xf32> to vector<16x96xf32>
    %10 = arith.addf %6, %9 : vector<16x96xf32>
    %11 = vector.extract_strided_slice %10 {offsets = [0, 0], sizes = [16, 8], strides = [1, 1]} : vector<16x96xf32> to vector<16x8xf32>
    %12 = vector.shape_cast %11 : vector<16x8xf32> to vector<2x8x8xf32>
    %13 = vector.extract_strided_slice %10 {offsets = [0, 32], sizes = [16, 8], strides = [1, 1]} : vector<16x96xf32> to vector<16x8xf32>
    %14 = vector.shape_cast %13 : vector<16x8xf32> to vector<2x8x8xf32>
    %15 = vector.extract_strided_slice %10 {offsets = [0, 64], sizes = [16, 8], strides = [1, 1]} : vector<16x96xf32> to vector<16x8xf32>
    %16 = vector.shape_cast %15 : vector<16x8xf32> to vector<2x8x8xf32>
    "tpu.trace_start"() <{level = 10 : i32, message = "bqd,bkd->bqk"}> : () -> ()
    %cst_8 = arith.constant dense<0.000000e+00> : vector<2x8x8xf32>
    %17 = tpu.matmul %12, %14, %cst_8 {dimension_numbers = #tpu.dot_dimension_numbers<[2], [2], [1], [1], [0, 0, 0, 1, 1, 1], [0], [0]>} : vector<2x8x8xf32>, vector<2x8x8xf32>, vector<2x8x8xf32> -> vector<2x8x8xf32>
    "tpu.trace_stop"() : () -> ()
    %cst_9 = arith.constant dense<0xFF800000> : vector<2x8xf32>
    %18 = vector.multi_reduction <maximumf>, %17, %cst_9 [2] : vector<2x8x8xf32> to vector<2x8xf32>
    %19 = vector.shape_cast %18 : vector<2x8xf32> to vector<2x8x1xf32>
    %20 = vector.broadcast %19 : vector<2x8x1xf32> to vector<2x8x8xf32>
    %21 = arith.subf %17, %20 : vector<2x8x8xf32>
    %22 = math.exp %21 : vector<2x8x8xf32>
    %cst_10 = arith.constant dense<0.000000e+00> : vector<2x8xf32>
    %23 = vector.multi_reduction <add>, %22, %cst_10 [2] : vector<2x8x8xf32> to vector<2x8xf32>
    %24 = vector.shape_cast %23 : vector<2x8xf32> to vector<2x8x1xf32>
    %25 = tpu.reciprocal %24 {approx = true} : vector<2x8x1xf32> -> vector<2x8x1xf32>
    %26 = vector.broadcast %25 : vector<2x8x1xf32> to vector<2x8x8xf32>
    %27 = arith.mulf %22, %26 : vector<2x8x8xf32>
    "tpu.trace_start"() <{level = 10 : i32, message = "bqk,bkd->bqd"}> : () -> ()
    %cst_11 = arith.constant dense<0.000000e+00> : vector<2x8x8xf32>
    %28 = tpu.matmul %27, %16, %cst_11 {dimension_numbers = #tpu.dot_dimension_numbers<[2], [1], [1], [2], [0, 0, 0, 1, 1, 2], [0], [0]>} : vector<2x8x8xf32>, vector<2x8x8xf32>, vector<2x8x8xf32> -> vector<2x8x8xf32>
    "tpu.trace_stop"() : () -> ()
    %29 = vector.shape_cast %28 : vector<2x8x8xf32> to vector<16x8xf32>
    %30 = vector.extract_strided_slice %10 {offsets = [0, 8], sizes = [16, 8], strides = [1, 1]} : vector<16x96xf32> to vector<16x8xf32>
    %31 = vector.shape_cast %30 : vector<16x8xf32> to vector<2x8x8xf32>
    %32 = vector.extract_strided_slice %10 {offsets = [0, 40], sizes = [16, 8], strides = [1, 1]} : vector<16x96xf32> to vector<16x8xf32>
    %33 = vector.shape_cast %32 : vector<16x8xf32> to vector<2x8x8xf32>
    %34 = vector.extract_strided_slice %10 {offsets = [0, 72], sizes = [16, 8], strides = [1, 1]} : vector<16x96xf32> to vector<16x8xf32>
    %35 = vector.shape_cast %34 : vector<16x8xf32> to vector<2x8x8xf32>
    "tpu.trace_start"() <{level = 10 : i32, message = "bqd,bkd->bqk"}> : () -> ()
    %cst_12 = arith.constant dense<0.000000e+00> : vector<2x8x8xf32>
    %36 = tpu.matmul %31, %33, %cst_12 {dimension_numbers = #tpu.dot_dimension_numbers<[2], [2], [1], [1], [0, 0, 0, 1, 1, 1], [0], [0]>} : vector<2x8x8xf32>, vector<2x8x8xf32>, vector<2x8x8xf32> -> vector<2x8x8xf32>
    "tpu.trace_stop"() : () -> ()
    %cst_13 = arith.constant dense<0xFF800000> : vector<2x8xf32>
    %37 = vector.multi_reduction <maximumf>, %36, %cst_13 [2] : vector<2x8x8xf32> to vector<2x8xf32>
    %38 = vector.shape_cast %37 : vector<2x8xf32> to vector<2x8x1xf32>
    %39 = vector.broadcast %38 : vector<2x8x1xf32> to vector<2x8x8xf32>
    %40 = arith.subf %36, %39 : vector<2x8x8xf32>
    %41 = math.exp %40 : vector<2x8x8xf32>
    %cst_14 = arith.constant dense<0.000000e+00> : vector<2x8xf32>
    %42 = vector.multi_reduction <add>, %41, %cst_14 [2] : vector<2x8x8xf32> to vector<2x8xf32>
    %43 = vector.shape_cast %42 : vector<2x8xf32> to vector<2x8x1xf32>
    %44 = tpu.reciprocal %43 {approx = true} : vector<2x8x1xf32> -> vector<2x8x1xf32>
    %45 = vector.broadcast %44 : vector<2x8x1xf32> to vector<2x8x8xf32>
    %46 = arith.mulf %41, %45 : vector<2x8x8xf32>
    "tpu.trace_start"() <{level = 10 : i32, message = "bqk,bkd->bqd"}> : () -> ()
    %cst_15 = arith.constant dense<0.000000e+00> : vector<2x8x8xf32>
    %47 = tpu.matmul %46, %35, %cst_15 {dimension_numbers = #tpu.dot_dimension_numbers<[2], [1], [1], [2], [0, 0, 0, 1, 1, 2], [0], [0]>} : vector<2x8x8xf32>, vector<2x8x8xf32>, vector<2x8x8xf32> -> vector<2x8x8xf32>
    "tpu.trace_stop"() : () -> ()
    %48 = vector.shape_cast %47 : vector<2x8x8xf32> to vector<16x8xf32>
    %49 = vector.extract_strided_slice %10 {offsets = [0, 16], sizes = [16, 8], strides = [1, 1]} : vector<16x96xf32> to vector<16x8xf32>
    %50 = vector.shape_cast %49 : vector<16x8xf32> to vector<2x8x8xf32>
    %51 = vector.extract_strided_slice %10 {offsets = [0, 48], sizes = [16, 8], strides = [1, 1]} : vector<16x96xf32> to vector<16x8xf32>
    %52 = vector.shape_cast %51 : vector<16x8xf32> to vector<2x8x8xf32>
    %53 = vector.extract_strided_slice %10 {offsets = [0, 80], sizes = [16, 8], strides = [1, 1]} : vector<16x96xf32> to vector<16x8xf32>
    %54 = vector.shape_cast %53 : vector<16x8xf32> to vector<2x8x8xf32>
    "tpu.trace_start"() <{level = 10 : i32, message = "bqd,bkd->bqk"}> : () -> ()
    %cst_16 = arith.constant dense<0.000000e+00> : vector<2x8x8xf32>
    %55 = tpu.matmul %50, %52, %cst_16 {dimension_numbers = #tpu.dot_dimension_numbers<[2], [2], [1], [1], [0, 0, 0, 1, 1, 1], [0], [0]>} : vector<2x8x8xf32>, vector<2x8x8xf32>, vector<2x8x8xf32> -> vector<2x8x8xf32>
    "tpu.trace_stop"() : () -> ()
    %cst_17 = arith.constant dense<0xFF800000> : vector<2x8xf32>
    %56 = vector.multi_reduction <maximumf>, %55, %cst_17 [2] : vector<2x8x8xf32> to vector<2x8xf32>
    %57 = vector.shape_cast %56 : vector<2x8xf32> to vector<2x8x1xf32>
    %58 = vector.broadcast %57 : vector<2x8x1xf32> to vector<2x8x8xf32>
    %59 = arith.subf %55, %58 : vector<2x8x8xf32>
    %60 = math.exp %59 : vector<2x8x8xf32>
    %cst_18 = arith.constant dense<0.000000e+00> : vector<2x8xf32>
    %61 = vector.multi_reduction <add>, %60, %cst_18 [2] : vector<2x8x8xf32> to vector<2x8xf32>
    %62 = vector.shape_cast %61 : vector<2x8xf32> to vector<2x8x1xf32>
    %63 = tpu.reciprocal %62 {approx = true} : vector<2x8x1xf32> -> vector<2x8x1xf32>
    %64 = vector.broadcast %63 : vector<2x8x1xf32> to vector<2x8x8xf32>
    %65 = arith.mulf %60, %64 : vector<2x8x8xf32>
    "tpu.trace_start"() <{level = 10 : i32, message = "bqk,bkd->bqd"}> : () -> ()
    %cst_19 = arith.constant dense<0.000000e+00> : vector<2x8x8xf32>
    %66 = tpu.matmul %65, %54, %cst_19 {dimension_numbers = #tpu.dot_dimension_numbers<[2], [1], [1], [2], [0, 0, 0, 1, 1, 2], [0], [0]>} : vector<2x8x8xf32>, vector<2x8x8xf32>, vector<2x8x8xf32> -> vector<2x8x8xf32>
    "tpu.trace_stop"() : () -> ()
    %67 = vector.shape_cast %66 : vector<2x8x8xf32> to vector<16x8xf32>
    %68 = vector.extract_strided_slice %10 {offsets = [0, 24], sizes = [16, 8], strides = [1, 1]} : vector<16x96xf32> to vector<16x8xf32>
    %69 = vector.shape_cast %68 : vector<16x8xf32> to vector<2x8x8xf32>
    %70 = vector.extract_strided_slice %10 {offsets = [0, 56], sizes = [16, 8], strides = [1, 1]} : vector<16x96xf32> to vector<16x8xf32>
    %71 = vector.shape_cast %70 : vector<16x8xf32> to vector<2x8x8xf32>
    %72 = vector.extract_strided_slice %10 {offsets = [0, 88], sizes = [16, 8], strides = [1, 1]} : vector<16x96xf32> to vector<16x8xf32>
    %73 = vector.shape_cast %72 : vector<16x8xf32> to vector<2x8x8xf32>
    "tpu.trace_start"() <{level = 10 : i32, message = "bqd,bkd->bqk"}> : () -> ()
    %cst_20 = arith.constant dense<0.000000e+00> : vector<2x8x8xf32>
    %74 = tpu.matmul %69, %71, %cst_20 {dimension_numbers = #tpu.dot_dimension_numbers<[2], [2], [1], [1], [0, 0, 0, 1, 1, 1], [0], [0]>} : vector<2x8x8xf32>, vector<2x8x8xf32>, vector<2x8x8xf32> -> vector<2x8x8xf32>
    "tpu.trace_stop"() : () -> ()
    %cst_21 = arith.constant dense<0xFF800000> : vector<2x8xf32>
    %75 = vector.multi_reduction <maximumf>, %74, %cst_21 [2] : vector<2x8x8xf32> to vector<2x8xf32>
    %76 = vector.shape_cast %75 : vector<2x8xf32> to vector<2x8x1xf32>
    %77 = vector.broadcast %76 : vector<2x8x1xf32> to vector<2x8x8xf32>
    %78 = arith.subf %74, %77 : vector<2x8x8xf32>
    %79 = math.exp %78 : vector<2x8x8xf32>
    %cst_22 = arith.constant dense<0.000000e+00> : vector<2x8xf32>
    %80 = vector.multi_reduction <add>, %79, %cst_22 [2] : vector<2x8x8xf32> to vector<2x8xf32>
    %81 = vector.shape_cast %80 : vector<2x8xf32> to vector<2x8x1xf32>
    %82 = tpu.reciprocal %81 {approx = true} : vector<2x8x1xf32> -> vector<2x8x1xf32>
    %83 = vector.broadcast %82 : vector<2x8x1xf32> to vector<2x8x8xf32>
    %84 = arith.mulf %79, %83 : vector<2x8x8xf32>
    "tpu.trace_start"() <{level = 10 : i32, message = "bqk,bkd->bqd"}> : () -> ()
    %cst_23 = arith.constant dense<0.000000e+00> : vector<2x8x8xf32>
    %85 = tpu.matmul %84, %73, %cst_23 {dimension_numbers = #tpu.dot_dimension_numbers<[2], [1], [1], [2], [0, 0, 0, 1, 1, 2], [0], [0]>} : vector<2x8x8xf32>, vector<2x8x8xf32>, vector<2x8x8xf32> -> vector<2x8x8xf32>
    "tpu.trace_stop"() : () -> ()
    %86 = vector.shape_cast %85 : vector<2x8x8xf32> to vector<16x8xf32>
    %87 = tpu.concatenate %29, %48, %67, %86 in 1 : vector<16x8xf32>, vector<16x8xf32>, vector<16x8xf32>, vector<16x8xf32> -> vector<16x32xf32>
    %c0_24 = arith.constant 0 : index
    %c0_25 = arith.constant 0 : index
    %c0_26 = arith.constant 0 : index
    %88 = vector.load %arg6[%c0_24, %c0_25, %c0_26] : memref<1x32x32xf32, #tpu.memory_space<vmem>>, vector<1x32x32xf32>
    %89 = vector.shape_cast %88 : vector<1x32x32xf32> to vector<32x32xf32>
    %cst_27 = arith.constant dense<0.000000e+00> : vector<16x32xf32>
    %90 = tpu.matmul %87, %89, %cst_27 {dimension_numbers = #tpu.dot_dimension_numbers<[1], [0], [0], [1], [0, 0, 1, 1], [], []>} : vector<16x32xf32>, vector<32x32xf32>, vector<16x32xf32> -> vector<16x32xf32>
    %c0_28 = arith.constant 0 : index
    %c0_29 = arith.constant 0 : index
    %c0_30 = arith.constant 0 : index
    %91 = vector.load %arg7[%c0_28, %c0_29, %c0_30] : memref<1x1x32xf32, #tpu.memory_space<vmem>>, vector<1x1x32xf32>
    %92 = vector.shape_cast %91 : vector<1x1x32xf32> to vector<1x32xf32>
    %93 = vector.broadcast %92 : vector<1x32xf32> to vector<16x32xf32>
    %94 = arith.addf %90, %93 : vector<16x32xf32>
    %95 = arith.addf %3, %94 : vector<16x32xf32>
    %c0_31 = arith.constant 0 : index
    %c0_32 = arith.constant 0 : index
    %c0_33 = arith.constant 0 : index
    %96 = vector.load %arg8[%c0_31, %c0_32, %c0_33] : memref<1x1x32xf32, #tpu.memory_space<vmem>>, vector<1x1x32xf32>
    %97 = vector.shape_cast %96 : vector<1x1x32xf32> to vector<1x32xf32>
    %c0_34 = arith.constant 0 : index
    %c0_35 = arith.constant 0 : index
    %c0_36 = arith.constant 0 : index
    %98 = vector.load %arg9[%c0_34, %c0_35, %c0_36] : memref<1x1x32xf32, #tpu.memory_space<vmem>>, vector<1x1x32xf32>
    %99 = vector.shape_cast %98 : vector<1x1x32xf32> to vector<1x32xf32>
    %cst_37 = arith.constant dense<0.000000e+00> : vector<16xf32>
    %100 = vector.multi_reduction <add>, %95, %cst_37 [1] : vector<16x32xf32> to vector<16xf32>
    %101 = vector.shape_cast %100 : vector<16xf32> to vector<16x1xf32>
    %cst_38 = arith.constant 3.200000e+01 : f32
    %102 = vector.broadcast %cst_38 : f32 to vector<16x1xf32>
    %103 = arith.divf %101, %102 : vector<16x1xf32>
    %104 = vector.broadcast %103 : vector<16x1xf32> to vector<16x32xf32>
    %105 = arith.subf %95, %104 : vector<16x32xf32>
    %106 = arith.mulf %105, %105 : vector<16x32xf32>
    %cst_39 = arith.constant dense<0.000000e+00> : vector<16xf32>
    %107 = vector.multi_reduction <add>, %106, %cst_39 [1] : vector<16x32xf32> to vector<16xf32>
    %108 = vector.shape_cast %107 : vector<16xf32> to vector<16x1xf32>
    %cst_40 = arith.constant 3.200000e+01 : f32
    %109 = vector.broadcast %cst_40 : f32 to vector<16x1xf32>
    %110 = arith.divf %108, %109 : vector<16x1xf32>
    %111 = vector.broadcast %103 : vector<16x1xf32> to vector<16x32xf32>
    %112 = arith.subf %95, %111 : vector<16x32xf32>
    %cst_41 = arith.constant 9.99999974E-6 : f32
    %113 = vector.broadcast %cst_41 : f32 to vector<16x1xf32>
    %114 = arith.addf %110, %113 : vector<16x1xf32>
    %115 = math.rsqrt %114 : vector<16x1xf32>
    %116 = vector.broadcast %115 : vector<16x1xf32> to vector<16x32xf32>
    %117 = arith.mulf %112, %116 : vector<16x32xf32>
    %118 = vector.broadcast %97 : vector<1x32xf32> to vector<16x32xf32>
    %119 = arith.mulf %117, %118 : vector<16x32xf32>
    %120 = vector.broadcast %99 : vector<1x32xf32> to vector<16x32xf32>
    %121 = arith.addf %119, %120 : vector<16x32xf32>
    %c0_42 = arith.constant 0 : index
    %c0_43 = arith.constant 0 : index
    %c0_44 = arith.constant 0 : index
    %122 = vector.load %arg10[%c0_42, %c0_43, %c0_44] : memref<1x32x64xf32, #tpu.memory_space<vmem>>, vector<1x32x64xf32>
    %123 = vector.shape_cast %122 : vector<1x32x64xf32> to vector<32x64xf32>
    %cst_45 = arith.constant dense<0.000000e+00> : vector<16x64xf32>
    %124 = tpu.matmul %121, %123, %cst_45 {dimension_numbers = #tpu.dot_dimension_numbers<[1], [0], [0], [1], [0, 0, 1, 1], [], []>} : vector<16x32xf32>, vector<32x64xf32>, vector<16x64xf32> -> vector<16x64xf32>
    %c0_46 = arith.constant 0 : index
    %c0_47 = arith.constant 0 : index
    %c0_48 = arith.constant 0 : index
    %125 = vector.load %arg11[%c0_46, %c0_47, %c0_48] : memref<1x1x64xf32, #tpu.memory_space<vmem>>, vector<1x1x64xf32>
    %126 = vector.shape_cast %125 : vector<1x1x64xf32> to vector<1x64xf32>
    %127 = vector.broadcast %126 : vector<1x64xf32> to vector<16x64xf32>
    %128 = arith.addf %124, %127 : vector<16x64xf32>
    %cst_49 = arith.constant 0.000000e+00 : f32
    %129 = vector.broadcast %cst_49 : f32 to vector<16x64xf32>
    %130 = arith.maximumf %128, %129 : vector<16x64xf32>
    %c0_50 = arith.constant 0 : index
    %c0_51 = arith.constant 0 : index
    %c0_52 = arith.constant 0 : index
    %131 = vector.load %arg12[%c0_50, %c0_51, %c0_52] : memref<1x64x32xf32, #tpu.memory_space<vmem>>, vector<1x64x32xf32>
    %132 = vector.shape_cast %131 : vector<1x64x32xf32> to vector<64x32xf32>
    %cst_53 = arith.constant dense<0.000000e+00> : vector<16x32xf32>
    %133 = tpu.matmul %130, %132, %cst_53 {dimension_numbers = #tpu.dot_dimension_numbers<[1], [0], [0], [1], [0, 0, 1, 1], [], []>} : vector<16x64xf32>, vector<64x32xf32>, vector<16x32xf32> -> vector<16x32xf32>
    %c0_54 = arith.constant 0 : index
    %c0_55 = arith.constant 0 : index
    %c0_56 = arith.constant 0 : index
    %134 = vector.load %arg13[%c0_54, %c0_55, %c0_56] : memref<1x1x32xf32, #tpu.memory_space<vmem>>, vector<1x1x32xf32>
    %135 = vector.shape_cast %134 : vector<1x1x32xf32> to vector<1x32xf32>
    %136 = vector.broadcast %135 : vector<1x32xf32> to vector<16x32xf32>
    %137 = arith.addf %133, %136 : vector<16x32xf32>
    %138 = arith.addf %121, %137 : vector<16x32xf32>
    %c0_57 = arith.constant 0 : index
    %c0_58 = arith.constant 0 : index
    %c0_59 = arith.constant 0 : index
    %139 = vector.load %arg14[%c0_57, %c0_58, %c0_59] : memref<1x1x32xf32, #tpu.memory_space<vmem>>, vector<1x1x32xf32>
    %140 = vector.shape_cast %139 : vector<1x1x32xf32> to vector<1x32xf32>
    %c0_60 = arith.constant 0 : index
    %c0_61 = arith.constant 0 : index
    %c0_62 = arith.constant 0 : index
    %141 = vector.load %arg15[%c0_60, %c0_61, %c0_62] : memref<1x1x32xf32, #tpu.memory_space<vmem>>, vector<1x1x32xf32>
    %142 = vector.shape_cast %141 : vector<1x1x32xf32> to vector<1x32xf32>
    %cst_63 = arith.constant dense<0.000000e+00> : vector<16xf32>
    %143 = vector.multi_reduction <add>, %138, %cst_63 [1] : vector<16x32xf32> to vector<16xf32>
    %144 = vector.shape_cast %143 : vector<16xf32> to vector<16x1xf32>
    %cst_64 = arith.constant 3.200000e+01 : f32
    %145 = vector.broadcast %cst_64 : f32 to vector<16x1xf32>
    %146 = arith.divf %144, %145 : vector<16x1xf32>
    %147 = vector.broadcast %146 : vector<16x1xf32> to vector<16x32xf32>
    %148 = arith.subf %138, %147 : vector<16x32xf32>
    %149 = arith.mulf %148, %148 : vector<16x32xf32>
    %cst_65 = arith.constant dense<0.000000e+00> : vector<16xf32>
    %150 = vector.multi_reduction <add>, %149, %cst_65 [1] : vector<16x32xf32> to vector<16xf32>
    %151 = vector.shape_cast %150 : vector<16xf32> to vector<16x1xf32>
    %cst_66 = arith.constant 3.200000e+01 : f32
    %152 = vector.broadcast %cst_66 : f32 to vector<16x1xf32>
    %153 = arith.divf %151, %152 : vector<16x1xf32>
    %154 = vector.broadcast %146 : vector<16x1xf32> to vector<16x32xf32>
    %155 = arith.subf %138, %154 : vector<16x32xf32>
    %cst_67 = arith.constant 9.99999974E-6 : f32
    %156 = vector.broadcast %cst_67 : f32 to vector<16x1xf32>
    %157 = arith.addf %153, %156 : vector<16x1xf32>
    %158 = math.rsqrt %157 : vector<16x1xf32>
    %159 = vector.broadcast %158 : vector<16x1xf32> to vector<16x32xf32>
    %160 = arith.mulf %155, %159 : vector<16x32xf32>
    %161 = vector.broadcast %140 : vector<1x32xf32> to vector<16x32xf32>
    %162 = arith.mulf %160, %161 : vector<16x32xf32>
    %163 = vector.broadcast %142 : vector<1x32xf32> to vector<16x32xf32>
    %164 = arith.addf %162, %163 : vector<16x32xf32>
    %c0_68 = arith.constant 0 : index
    %c0_69 = arith.constant 0 : index
    %165 = vector.load %arg17[%c0_68, %c0_69] : memref<16x32xf32, #tpu.memory_space<vmem>>, vector<16x32xf32>
    tpu.vector_store %arg17[%c0_68, %c0_69], %164 {strides = array<i32>} : memref<16x32xf32, #tpu.memory_space<vmem>>, vector<16x32xf32>,
    %c1_i32 = arith.constant 1 : i32
    %166 = arith.cmpi eq, %arg1, %c1_i32 : i32
    %167 = arith.extui %166 : i1 to i32
    %c0_i32_70 = arith.constant 0 : i32
    %168 = arith.cmpi ne, %167, %c0_i32_70 : i32
    scf.if %168 {
      %169 = vector.shape_cast %164 : vector<16x32xf32> to vector<2x8x32xf32>
      %c0_71 = arith.constant 0 : index
      %c0_72 = arith.constant 0 : index
      %c0_73 = arith.constant 0 : index
      %170 = vector.load %arg16[%c0_71, %c0_72, %c0_73] : memref<2x8x32xf32, #tpu.memory_space<vmem>>, vector<2x8x32xf32>
      tpu.vector_store %arg16[%c0_71, %c0_72, %c0_73], %169 {strides = array<i32>} : memref<2x8x32xf32, #tpu.memory_space<vmem>>, vector<2x8x32xf32>,
    } else {
    }
    return
  }
  func.func @transform_0(%arg0: i32, %arg1: i32) -> (i32, i32, i32) {
    %c0_i32 = arith.constant 0 : i32
    %c0_i32_0 = arith.constant 0 : i32
    %c0_i32_1 = arith.constant 0 : i32
    return %arg0, %c0_i32, %c0_i32_0 : i32, i32, i32
  }
  func.func @transform_1(%arg0: i32, %arg1: i32) -> (i32, i32) {
    %c0_i32 = arith.constant 0 : i32
    %c0_i32_0 = arith.constant 0 : i32
    %c0_i32_1 = arith.constant 0 : i32
    return %c0_i32, %c0_i32_0 : i32, i32
  }
  func.func @transform_2(%arg0: i32, %arg1: i32) -> (i32, i32, i32) {
    %c0_i32 = arith.constant 0 : i32
    %c0_i32_0 = arith.constant 0 : i32
    %c0_i32_1 = arith.constant 0 : i32
    return %arg1, %c0_i32, %c0_i32_0 : i32, i32, i32
  }
  func.func @transform_3(%arg0: i32, %arg1: i32) -> (i32, i32, i32) {
    %c0_i32 = arith.constant 0 : i32
    %c0_i32_0 = arith.constant 0 : i32
    %c0_i32_1 = arith.constant 0 : i32
    return %arg1, %c0_i32, %c0_i32_0 : i32, i32, i32
  }
  func.func @transform_4(%arg0: i32, %arg1: i32) -> (i32, i32, i32) {
    %c0_i32 = arith.constant 0 : i32
    %c0_i32_0 = arith.constant 0 : i32
    %c0_i32_1 = arith.constant 0 : i32
    return %arg1, %c0_i32, %c0_i32_0 : i32, i32, i32
  }
  func.func @transform_5(%arg0: i32, %arg1: i32) -> (i32, i32, i32) {
    %c0_i32 = arith.constant 0 : i32
    %c0_i32_0 = arith.constant 0 : i32
    %c0_i32_1 = arith.constant 0 : i32
    return %arg1, %c0_i32, %c0_i32_0 : i32, i32, i32
  }
  func.func @transform_6(%arg0: i32, %arg1: i32) -> (i32, i32, i32) {
    %c0_i32 = arith.constant 0 : i32
    %c0_i32_0 = arith.constant 0 : i32
    %c0_i32_1 = arith.constant 0 : i32
    return %arg1, %c0_i32, %c0_i32_0 : i32, i32, i32
  }
  func.func @transform_7(%arg0: i32, %arg1: i32) -> (i32, i32, i32) {
    %c0_i32 = arith.constant 0 : i32
    %c0_i32_0 = arith.constant 0 : i32
    %c0_i32_1 = arith.constant 0 : i32
    return %arg1, %c0_i32, %c0_i32_0 : i32, i32, i32
  }
  func.func @transform_8(%arg0: i32, %arg1: i32) -> (i32, i32, i32) {
    %c0_i32 = arith.constant 0 : i32
    %c0_i32_0 = arith.constant 0 : i32
    %c0_i32_1 = arith.constant 0 : i32
    return %arg1, %c0_i32, %c0_i32_0 : i32, i32, i32
  }
  func.func @transform_9(%arg0: i32, %arg1: i32) -> (i32, i32, i32) {
    %c0_i32 = arith.constant 0 : i32
    %c0_i32_0 = arith.constant 0 : i32
    %c0_i32_1 = arith.constant 0 : i32
    return %arg1, %c0_i32, %c0_i32_0 : i32, i32, i32
  }
  func.func @transform_10(%arg0: i32, %arg1: i32) -> (i32, i32, i32) {
    %c0_i32 = arith.constant 0 : i32
    %c0_i32_0 = arith.constant 0 : i32
    %c0_i32_1 = arith.constant 0 : i32
    return %arg1, %c0_i32, %c0_i32_0 : i32, i32, i32
  }
  func.func @transform_11(%arg0: i32, %arg1: i32) -> (i32, i32, i32) {
    %c0_i32 = arith.constant 0 : i32
    %c0_i32_0 = arith.constant 0 : i32
    %c0_i32_1 = arith.constant 0 : i32
    return %arg1, %c0_i32, %c0_i32_0 : i32, i32, i32
  }
  func.func @transform_12(%arg0: i32, %arg1: i32) -> (i32, i32, i32) {
    %c0_i32 = arith.constant 0 : i32
    %c0_i32_0 = arith.constant 0 : i32
    %c0_i32_1 = arith.constant 0 : i32
    return %arg1, %c0_i32, %c0_i32_0 : i32, i32, i32
  }
  func.func @transform_13(%arg0: i32, %arg1: i32) -> (i32, i32, i32) {
    %c0_i32 = arith.constant 0 : i32
    %c0_i32_0 = arith.constant 0 : i32
    %c0_i32_1 = arith.constant 0 : i32
    return %arg1, %c0_i32, %c0_i32_0 : i32, i32, i32
  }
  func.func @transform_14(%arg0: i32, %arg1: i32) -> (i32, i32, i32) {
    %c0_i32 = arith.constant 0 : i32
    %c0_i32_0 = arith.constant 0 : i32
    %c0_i32_1 = arith.constant 0 : i32
    return %arg0, %c0_i32, %c0_i32_0 : i32, i32, i32
  }
}

</mosaic_0001>

<bundles_post_ra>
// kernel: tpu_custom_call.1
= control target key start
LH: loop header
LB: loop body
LE: loop exit
PB: predicated region body
PF: predicated region fallthrough
CT: control target
= control target key end

     0   :  { %s2740_s0 = inlined_call_operand.hbm [shape: f32[2,8,32], index: 0, kind: input, shape index: {}]   ;;  %s2741_s1 = inlined_call_operand.hbm [shape: f32[8,32], index: 1, kind: input, shape index: {}]   ;;  %s2742_s2 = inlined_call_operand.vmem [shape: f32[2,32,96], index: 2, kind: input, shape index: {}]   ;;  %s2743_s3 = inlined_call_operand.vmem [shape: f32[2,1,96], index: 3, kind: input, shape index: {}]   ;;  %s2744_s4 = inlined_call_operand.vmem [shape: f32[2,32,32], index: 4, kind: input, shape index: {}]   ;;  %s2745_s5 = inlined_call_operand.hbm [shape: f32[2,1,32], index: 5, kind: input, shape index: {}]   ;;  %s2746_s6 = inlined_call_operand.vmem [shape: f32[2,1,32], index: 6, kind: input, shape index: {}]   ;;  %s2747_s7 = inlined_call_operand.hbm [shape: f32[2,1,32], index: 7, kind: input, shape index: {}]   ;;  %s2748_s8 = inlined_call_operand.vmem [shape: f32[2,32,64], index: 8, kind: input, shape index: {}]   ;;  %s2749_s9 = inlined_call_operand.vmem [shape: f32[2,1,64], index: 9, kind: input, shape index: {}]   ;;  %s2750_s10 = inlined_call_operand.vmem [shape: f32[2,64,32], index: 10, kind: input, shape index: {}]   ;;  %s2751_s11 = inlined_call_operand.vmem [shape: f32[2,1,32], index: 11, kind: input, shape index: {}]   ;;  %s2752_s12 = inlined_call_operand.vmem [shape: f32[2,1,32], index: 12, kind: input, shape index: {}]   ;;  %s2753_s13 = inlined_call_operand.hbm [shape: f32[2,1,32], index: 13, kind: input, shape index: {}]   ;;  %s2754_s14 = inlined_call_operand.hbm [shape: f32[2,8,32], index: 14, kind: output, shape index: {}]  }
   0x1   :  { %2758 = sst [smem:[#allocation20_spill]] %s2740_s0 }
   0x2   :  { %2759 = sst [smem:[#allocation21_spill]] %s2741_s1 }
   0x3   :  { %2760 = sst [smem:[#allocation22_spill]] %s2742_s2 }
   0x4   :  { %2761 = sst [smem:[#allocation23_spill]] %s2744_s4 }
   0x5   :  { %2762 = sst [smem:[#allocation24_spill]] %s2745_s5 }
   0x6   :  { %2763 = sst [smem:[#allocation25_spill]] %s2747_s7 }
   0x7   :  { %2764 = sst [smem:[#allocation26_spill]] %s2748_s8 }
   0x8   :  { %2765 = sst [smem:[#allocation27_spill]] %s2749_s9 }
   0x9   :  { %2766 = sst [smem:[#allocation28_spill]] %s2750_s10 }
   0xa   :  { %2767 = sst [smem:[#allocation29_spill]] %s2751_s11 }
   0xb   :  { %2768 = sst [smem:[#allocation30_spill]] %s2752_s12 }
   0xc   :  { %2769 = sst [smem:[#allocation31_spill]] %s2753_s13 }
   0xd   :  { %2770 = sst [smem:[#allocation32_spill]] %s2754_s14 }
   0xe   :  { %19 = vsyncpa [#allocation4], 0 }
   0xf   :  { %20 = vsyncpa [#allocation7], 0 }
  0x10   :  { %21 = vsyncpa [#allocation5], 0  ;;  %s2370_s29 = smov 0   ;;  %s2372_s30 = smov 0  }
  0x11   :  { %s2374_s15 = smov 0   ;;  %s2376_s16 = smov 0  }
  0x12   :  { %s2378_s17 = smov 0   ;;  %s2380_s18 = smov 0  }
  0x13 LB: > { %2771 = sst [smem:[#allocation16_spill]] %s2260_s15  ;;  %s2399_s19 = sadd.s32 4294967295, %s2272_s18   ;;  %s2272_s18 = sphi %s2380_s18, %s27_s18   ;;  %s2268_s17 = sphi %s2378_s17, %s2802_s17   ;;  %s2264_s16 = sphi %s2376_s16, %s2805_s16   ;;  %s2260_s15 = sphi %s2374_s15, %s2800_s15   ;;  %s2256_s30 = sphi %s2372_s30, %s2804_s30   ;;  %s2252_s29 = sphi %s2370_s29, %s2803_s29  }
  0x14   : > { %2772 = sst [smem:[#allocation17_spill]] %s2268_s17  ;;  %p184_p0 = scmp.ne.s32.totalorder %s2256_s30, %s2252_s29 }
  0x15   : > { %p185_p1 = scmp.eq.s32.totalorder %s2399_s19, 0  ;;  %p1809_p2 = scmp.ge.s32.totalorder %s2272_s18, 1 }
  0x16   : > { %p429_p3 = scmp.lt.s32.totalorder %s2272_s18, 3  ;;  %s2774_s0 = sld [smem:[#allocation20_spill]] }
  0x17   : > { %p2407_p4 = por %p185_p1, %p184_p0  ;;  %s2274_s25 = smov [#allocation3]  }
  0x18   : > { %p2414_p5 = pnand %p1809_p2, %p429_p3  ;;  %s445_s26 = sshll.u32 %s2274_s25, 4  ;;  %s446_s26 = int_to_ptr.vmem [resolvable:$true] %s445_s26 }
  0x19   : > { %s2275_s28 = smov 128   ;;  %s2276_s29 = smov 8  }
  0x1a   : > { %p1884_p6 = pneg %p2414_p5  ;;  %s36_s21 = sadd.s32 1, %s2268_s17 }
  0x1b   : > { %p37_p8 = scmp.ge.s32.totalorder %s36_s21, 2  ;;  %s171_s22 = sadd.s32 1, %s2260_s15 }
  0x1c   : > { %s443_s23 = sshll.u32 %s2774_s0, 4  ;;  %p2422_p7 = pnand %p1884_p6, %p185_p1  ;;  %s444_s23 = int_to_ptr.hbm [resolvable:$true] %s443_s23 }
  0x1d   : > { %p178_p9 = scmp.ne.s32.totalorder %s2260_s15, %s2256_s30  ;;  %p179_p10 = scmp.eq.s32.totalorder %s2272_s18, 0 }
  0x1e   : > { %1887 = dma.hbm_to_vmem [thread:$0]  (!%p2422_p7), %s444_s23, 256, %s446_s26, [#allocation4], %s2275_s28, %s2275_s28, %s2276_s29  }
  0x1f   : > { %s2807_s21 = smov (%p37_p8, %s36_s21), 0  ;;  %p2435_p11 = por %p179_p10, %p178_p9 }
  0x20   : > { %2777 = sst [smem:[#allocation18_spill]] %s2807_s21  ;;  %p1903_p12 = scmp.lt.s32.totalorder %s2272_s18, 2 }
  0x21   : > { %s168_s0 = ssub.s32 %s2268_s17, %s2807_s21  ;;  %s493_s14 = sand.u32 1, %s2272_s18  }
  0x22   : > { %p169_p13 = scmp.eq.s32.totalorder %s168_s0, 0  ;;  %s495_s12 = sand.u32 1, %s2260_s15  }
  0x23   : > { %s2779_s5 = sld [smem:[#allocation24_spill]]  ;;  %s496_s10 = scalar_lea.vmem [#allocation8], %s495_s12 }
  0x24   : > { %s2449_s29 = scalar_select %p169_p13, %s2260_s15, %s171_s22  }
  0x25   : > { %s503_s9 = sshll.u32 %s496_s10, 4  ;;  %p2453_p0 = pnand %p1903_p12, %p2435_p11  ;;  %s504_s9 = int_to_ptr.vmem [resolvable:$true] %s503_s9 }
  0x26   : > { %2780 = sst [smem:[#allocation19_spill]] %s2449_s29  ;;  %s494_s26 = scalar_lea.sflag [#allocation4], %s493_s14 }
  0x27   : > { %s2782_s7 = sld [smem:[#allocation25_spill]]  ;;  %s519_s10 = scalar_lea.vmem [#allocation9], %s495_s12 }
  0x28   : > { %s526_s25 = sshll.u32 %s519_s10, 4  ;;  %s2783_s1 = sld [smem:[#allocation21_spill]]  ;;  %s527_s25 = int_to_ptr.vmem [resolvable:$true] %s526_s25 }
  0x29   : > { %s499_s28 = scalar_lea.hbm %s2779_s5, %s2268_s17  ;;  %s2277_s21 = smov [#allocation6]  }
  0x2a   : > { %s501_s11 = sshll.u32 %s499_s28, 4  ;;  %s460_s0 = sshll.u32 %s2277_s21, 4  ;;  %s502_s11 = int_to_ptr.hbm [resolvable:$true] %s501_s11  ;;  %s461_s0 = int_to_ptr.vmem [resolvable:$true] %s460_s0 }
  0x2b   : > { %1894 = dma.hbm_to_vmem [thread:$0]  (!%p2453_p0), %s502_s11, 16, %s504_s9, %s494_s26  }
  0x2c   : > { %s2784_s13 = sld [smem:[#allocation31_spill]]  ;;  %s570_s11 = scalar_lea.vmem [#allocation10], %s495_s12 }
  0x2d   : > { %s522_s23 = scalar_lea.hbm %s2782_s7, %s2268_s17  ;;  %s577_s10 = sshll.u32 %s570_s11, 4  ;;  %s578_s10 = int_to_ptr.vmem [resolvable:$true] %s577_s10 }
  0x2e   : > { %s524_s22 = sshll.u32 %s522_s23, 4  ;;  %s458_s29 = sshll.u32 %s2783_s1, 4  ;;  %s525_s22 = int_to_ptr.hbm [resolvable:$true] %s524_s22  ;;  %s459_s29 = int_to_ptr.hbm [resolvable:$true] %s458_s29 }
  0x2f   : > { %1897 = dma.hbm_to_vmem [thread:$0]  (!%p2453_p0), %s525_s22, 16, %s527_s25, %s494_s26  }
  0x30   : > { %1890 = dma.hbm_to_vmem [thread:$0]  (!%p2422_p7), %s459_s29, 128, %s461_s0, [#allocation7]  }
  0x31   : > { %586 = sbr.rel (%p2414_p5) target bundleno = 2335 (0x91f), region = 76 }
  0x32   : > { %s573_s14 = scalar_lea.hbm %s2784_s13, %s2268_s17 }
  0x33   : > { %s575_s9 = sshll.u32 %s573_s14, 4  ;;  %s576_s9 = int_to_ptr.hbm [resolvable:$true] %s575_s9 }
  0x34   : > { %1900 = dma.hbm_to_vmem [thread:$0]  (!%p2453_p0), %s576_s9, 16, %s578_s10, %s494_s26  }
  0x36   : > { %2235 = dma.done.wait (%p185_p1), [#allocation4], 256  }
  0x37   : > { %2237 = vsyncadd (%p185_p1), [#allocation4], 4294967040 }
  0x38   : > { %2239 = dma.done.wait (%p185_p1), [#allocation7], 128  }
  0x39   : > { %2241 = vsyncadd (%p185_p1), [#allocation7], 4294967168  ;;  %s598_s5 = sand.u32 1, %s2399_s19   ;;  %s2488_s7 = sand.u32 1, %s2256_s30  }
  0x3a   : > { %s599_s8 = scalar_lea.sflag [#allocation4], %s598_s5 }
  0x3b   : > { %2243 = dma.done.wait (%p2407_p4), %s599_s8, 48  }
  0x3c   : > { %2245 = vsyncadd (%p2407_p4), %s599_s8, 4294967248  ;;  %p703_p2 = scmp.lt.s32.totalorder %s2264_s16, 1  ;;  %s2785_s2 = sld [smem:[#allocation22_spill]] }
  0x3d   : > { %s2786_s4 = sld [smem:[#allocation23_spill]]  ;;  %s619_s5 = scalar_lea.vmem [#allocation10], %s2488_s7 }
  0x3e   : > { %s2497_s24 = scalar_select %p703_p2, %s2264_s16, 1 }
  0x3f   : > { %s2787_s8 = sld [smem:[#allocation26_spill]]  ;;  %p1824_p1 = scmp.ne.s32.totalorder %s2264_s16, 0 }
  0x40   : > { %s1862_s27 = sshll.u32 %s2497_s24, 5  ;;  %s2788_s20 = sld [smem:[#allocation27_spill]] }
  0x41   : > { %s1865_s26 = sshll.u32 %s2497_s24, 6  ;;  %s2789_s13 = sld [smem:[#allocation28_spill]] }
  0x42   : > { %s707_s28 = scalar_lea.vmem %s2785_s2, %s1862_s27  ;;  %s2790_s17 = sld [smem:[#allocation29_spill]] }
  0x43   : > { %s2510_s23 = scalar_lea.vmem %s2786_s4, %s1862_s27  ;;  %s2791_s15 = sld [smem:[#allocation30_spill]] }
  0x45   : > { %s2519_s12 = scalar_lea.vmem %s2787_s8, %s1862_s27  ;;  %s610_s27 = scalar_lea.vmem [#allocation9], %s2488_s7 }
  0x46   : > { %s726_s1 = scalar_lea.vmem %s2788_s20, %s2497_s24  ;;  %742 = sbr.rel (%p1824_p1) target bundleno = 80 (0x50), region = 100 }
  0x47   : > { %s2529_s21 = scalar_lea.vmem %s2789_s13, %s1865_s26 }
  0x48   : > { %s734_s14 = scalar_lea.vmem %s2790_s17, %s2497_s24 }
  0x49   : > { %s737_s10 = scalar_lea.vmem %s2791_s15, %s2497_s24 }
  0x4b   : > { %v743_v0 = vld [vmem:[#allocation3] sm:$0xff]  ;;  %v745_v1 = vld [vmem:[#allocation6] sm:$0xff]  ;;  %vm748_vm0 = vcmask 261120   ;;  %v744_v2 = vld [vmem:[#allocation3 + $0x8] sm:$0xff] }
  0x4c   : > { %v746_v3 = vadd.f32 %v745_v1, %v743_v0  ;;  %v747_v4 = vadd.f32 %v745_v1, %v744_v2 }
  0x4e   : > { %749 = vst.msk [vmem:[#allocation2] sm:$0xff] %vm748_vm0, %v746_v3 }
  0x4f   : > { %750 = vst.msk [vmem:[#allocation2 + $0x8] sm:$0xff] %vm748_vm0, %v747_v4 }
  0x50 PF: > { %v756_v5 = vld [vmem:[%s707_s28 + $0x18] sm:$0xff]  ;;  %v755_v6 = vld [vmem:[%s707_s28 + $0x10] sm:$0xff]  ;;  %v754_v7 = vld [vmem:[%s707_s28 + $0x8] sm:$0xff]  ;;  %vm761_vm1 = vcmask 261120   ;;  %s2792_s13 = scalar_lea.vmem %s2743_s3, %s2497_s24  ;;  %s2278_s15 = smov 64   ;;  %vm794_vm2 = vcmask 64512  }
  0x51   : > { %780 = vmatpush.msra.mxu0 %v756_v5  ;;  %v753_v8 = vld [vmem:[%s707_s28] sm:$0xff]  ;;  %s2279_s17 = smov 96   ;;  %s2280_s20 = smov 88   ;;  %vm1336_vm3 = vcmask 130048   ;;  %vm1339_vm4 = vcmask 195584   ;;  %vm1495_vm12 = vcmask 523264  }
  0x52   : > { %v1982_v11 = vld [vmem:[%s2792_s13] ss:$0 sm:$0xff]  ;;  %s2281_s28 = smov 120   ;;  %s2282_s11 = smov 72  }
  0x53   : > { %781 = vmatpush.msra.mxu0 %v755_v6  ;;  %s2283_s8 = smov 80   ;;  %s2284_s29 = smov 112  }
  0x54   : > { %s2285_s22 = smov 104   ;;  %s2286_s26 = smov 56  }
  0x55   : > { %782 = vmatpush.msra.mxu0 %v754_v7  ;;  %v2542_v9 = vld [vmem:[#allocation2] sm:$0xff]  ;;  %s2287_s25 = smov 40   ;;  %s2288_s0 = smov 48  }
  0x56   : > { %v2546_v10 = vld [vmem:[#allocation2 + $0x8] sm:$0xff]  ;;  %s2289_s9 = smov 8   ;;  %s2290_s2 = smov 16  }
  0x57   : > { %783 = vmatpush.msra.mxu0 %v753_v8  ;;  %s2291_s4 = smov 24   ;;  %p1857_p3 = scmp.ne.s32.totalorder %s2264_s16, 1 }
  0x58   : > { %1825 = vmatmul.msk.f32.vlgmr.msra.gmra.mxu0 %vm761_vm1, %v2542_v9 }
  0x60   : > { %1826 = vmatmul.msk.f32.gmra.mxu0 %vm761_vm1, %v2546_v10 }
  0xd5   : > { %v785_v12 = vpop.f32.mrf.mxu0 }
  0xd6   : > { %v2555_v13 = vadd.f32 %v1982_v11, %v785_v12 }
  0xd8   : > { %868 = vrot.lane.b32.xlu2 %v2555_v13, %s2278_s15  ;;  %792 = vrot.lane.b32.xlu0 %v2555_v13, %s2279_s17 }
  0xdd   : > { %v788_v14 = vpop.f32.mrf.mxu0 }
  0xde   : > { %v2560_v15 = vadd.f32 %v1982_v11, %v788_v14 }
  0xe0   : > { %820 = vrot.lane.b32.xlu1 %v2560_v15, %s2279_s17  ;;  %950 = vrot.lane.b32.xlu2 %v2560_v15, %s2280_s20  ;;  %v1977_v6 = vpack.i.bf16 %v2560_v15, %v2555_v13 }
  0xe8   : > { %920 = vrot.lane.b32.xlu1 %v2555_v13, %s2281_s28  ;;  %948 = vrot.lane.b32.xlu2 %v2560_v15, %s2281_s28 }
  0xf0   : > { %1182 = vrot.lane.b32.xlu1 %v2555_v13, %s2282_s11  ;;  %922 = vrot.lane.b32.xlu2 %v2555_v13, %s2280_s20 }
  0xf8   : > { %1052 = vrot.lane.b32.xlu2 %v2555_v13, %s2283_s8 }
 0x100   : > { %1050 = vrot.lane.b32.xlu2 %v2555_v13, %s2284_s29 }
 0x108   : > { %1180 = vrot.lane.b32.xlu2 %v2555_v13, %s2285_s22 }
 0x110   : > { %1210 = vrot.lane.b32.xlu2 %v2560_v15, %s2282_s11 }
 0x132   : > { %v869_v16 = vpop.permute.xlu2 %868 }
 0x13a   : > { %v951_v17 = vpop.permute.xlu2 %950 }
 0x142   : > { %v949_v18 = vpop.permute.xlu2 %948 }
 0x14a   : > { %v793_v19 = vpop.permute.xlu0 %792  ;;  %v923_v20 = vpop.permute.xlu2 %922 }
 0x14b   : > { %1827 = vmatpush.xpose.msk.msra.mxu1 %vm794_vm2, %v793_v19 }
 0x14e   : > { %1828 = vmatmul.msk.f32.vlgmr.msra.gmra.mxu1 %vm794_vm2, %v2555_v13 }
 0x14f   : > { %889 = vmatpush.msrb.mxu1 %v869_v16 }
 0x151   : > { %1833 = vmatpush.xpose.msk.msra.mxu1 %vm794_vm2, %v923_v20 }
 0x152   : > { %v821_v21 = vpop.permute.xlu1 %820  ;;  %v1053_v22 = vpop.permute.xlu2 %1052 }
 0x153   : > { %1829 = vmatpush.xpose.msk.msra.mxu2 %vm794_vm2, %v821_v21 }
 0x156   : > { %1830 = vmatmul.msk.f32.vlgmr.msra.gmra.mxu2 %vm794_vm2, %v2560_v15 }
 0x157   : > { %1835 = vmatpush.xpose.msk.msrb.mxu2 %vm794_vm2, %v951_v17 }
 0x15a   : > { %v921_v23 = vpop.permute.xlu1 %920  ;;  %v1051_v25 = vpop.permute.xlu2 %1050 }
 0x15b   : > { %1839 = vmatpush.xpose.msk.msra.mxu2 %vm794_vm2, %v1053_v22 }
 0x15e   : > { %1836 = vmatmul.msk.f32.vlgmr.msrb.gmra.mxu2 %vm794_vm2, %v949_v18 }
 0x162   : > { %v1183_v24 = vpop.permute.xlu1 %1182  ;;  %v1181_v26 = vpop.permute.xlu2 %1180 }
 0x163   : > { %1845 = vmatpush.xpose.msk.msrb.mxu2 %vm794_vm2, %v1183_v24 }
 0x166   : > { %1840 = vmatmul.msk.f32.vlgmr.msra.gmra.mxu2 %vm794_vm2, %v1051_v25 }
 0x16a   : > { %v1211_v44 = vpop.permute.xlu2 %1210 }
 0x16e   : > { %1846 = vmatmul.msk.f32.vlgmr.msrb.gmra.mxu2 %vm794_vm2, %v1181_v26 }
 0x1cb   : > { %v816_v27 = vpop.f32.mrf.mxu1 }
 0x1cc   : > { %v846_v28 = vsel %vm794_vm2, %v816_v27, -inf }
 0x1cd   : > { %847 = vmax.xlane.f32.xlu0 %v846_v28 }
 0x1d9   : > { %v843_v29 = vpop.f32.mrf.mxu2 }
 0x1da   : > { %v849_v30 = vsel %vm794_vm2, %v843_v29, -inf }
 0x1db   : > { %850 = vmax.xlane.f32.xlu2 %v849_v30 }
 0x1e1   : > { %1078 = vrot.lane.b32.xlu0 %v2560_v15, %s2284_s29  ;;  %v973_v31 = vpop.f32.mrf.mxu2 }
 0x1e2   : > { %v979_v39 = vsel %vm794_vm2, %v973_v31, -inf }
 0x1e3   : > { %980 = vmax.xlane.f32.xlu2 %v979_v39 }
 0x1e9   : > { %v1075_v32 = vpop.f32.mrf.mxu2 }
 0x1ea   : > { %v1106_v33 = vsel %vm794_vm2, %v1075_v32, -inf }
 0x1f1   : > { %v1205_v54 = vpop.f32.mrf.mxu2 }
 0x1f2   : > { %v1236_v56 = vsel %vm794_vm2, %v1205_v54, -inf }
 0x20b   : > { %1107 = vmax.xlane.f32.xlu0 %v1106_v33 }
 0x240   : > { %v848_v34 = vpop.xlane.xlu0 %847 }
 0x241   : > { %v852_v35 = vsub.f32 %v816_v27, %v848_v34 }
 0x243   : > { %v854_v36 = vmul.f32 1.442695, %v852_v35 }
 0x245   : > { %1990 = vpow2.f32 %v854_v36 }
 0x24b   : > { %v1991_v37 = vpop.eup %1990 }
 0x24c   : > { %v858_v38 = vsel %vm794_vm2, %v1991_v37, 0.0 }
 0x24d   : > { %859 = vadd.xlane.f32.xlu1 %v858_v38 }
 0x24e   : > { %v851_v48 = vpop.xlane.xlu2 %850 }
 0x24f   : > { %v853_v49 = vsub.f32 %v843_v29, %v851_v48 }
 0x251   : > { %v856_v52 = vmul.f32 1.442695, %v853_v49 }
 0x253   : > { %v1079_v45 = vpop.permute.xlu0 %1078 }
 0x256   : > { %v981_v60 = vpop.xlane.xlu2 %980 }
 0x257   : > { %v983_v62 = vsub.f32 %v973_v31, %v981_v60 }
 0x259   : > { %v986_v2 = vmul.f32 1.442695, %v983_v62 }
 0x266   : > { %1080 = vrot.lane.b32.xlu1 %v2560_v15, %s2283_s8 }
 0x26e   : > { %1208 = vrot.lane.b32.xlu1 %v2560_v15, %s2285_s22 }
 0x27e   : > { %v1108_v53 = vpop.xlane.xlu0 %1107 }
 0x27f   : > { %v1112_v55 = vsub.f32 %v1075_v32, %v1108_v53 }
 0x281   : > { %v1114_v59 = vmul.f32 1.442695, %v1112_v55 }
 0x2c0   : > { %v860_v40 = vpop.xlane.xlu1 %859 }
 0x2c1   : > { %1992 = vrcp.f32 %v860_v40 }
 0x2c2   : > { %1994 = vpow2.f32 %v856_v52 }
 0x2c3   : > { %1996 = vpow2.f32 %v1114_v59 }
 0x2c4   : > { %1998 = vpow2.f32 %v986_v2 }
 0x2c7   : > { %v1993_v41 = vpop.eup %1992 }
 0x2c8   : > { %v866_v42 = vmul.f32 %v1993_v41, %v1991_v37  ;;  %v1995_v61 = vpop.eup %1994 }
 0x2c9   : > { %v861_v63 = vsel %vm794_vm2, %v1995_v61, 0.0  ;;  %v2612_v3 = vpop.eup %1996 }
 0x2ca   : > { %1831 = vmatmul.msk.f32.vlgmr.msrb.gmra.mxu1 %vm794_vm2, %v866_v42  ;;  %v1118_v4 = vsel %vm794_vm2, %v2612_v3, 0.0  ;;  %v1999_v5 = vpop.eup %1998 }
 0x2cb   : > { %v991_v7 = vsel %vm794_vm2, %v1999_v5, 0.0 }
 0x2d2   : > { %1834 = vmatmul.msk.f32.vlgmr.msra.gmra.mxu1 %vm794_vm2, %v921_v23 }
 0x2d8   : > { %v1081_v43 = vpop.permute.xlu1 %1080 }
 0x2d9   : > { %1841 = vmatpush.xpose.msk.msrb.mxu0 %vm794_vm2, %v1081_v43 }
 0x2dc   : > { %1842 = vmatmul.msk.f32.vlgmr.msrb.gmra.mxu0 %vm794_vm2, %v1079_v45 }
 0x2dd   : > { %1847 = vmatpush.xpose.msk.msra.mxu0 %vm794_vm2, %v1211_v44 }
 0x2e0   : > { %v1209_v46 = vpop.permute.xlu1 %1208 }
 0x2e4   : > { %1848 = vmatmul.msk.f32.vlgmr.msra.gmra.mxu0 %vm794_vm2, %v1209_v46 }
 0x347   : > { %v2605_v47 = vpop.f32.mrf.mxu1 }
 0x34f   : > { %v945_v50 = vpop.f32.mrf.mxu1 }
 0x350   : > { %v976_v51 = vsel %vm794_vm2, %v945_v50, -inf }
 0x351   : > { %977 = vmax.xlane.f32.xlu1 %v976_v51 }
 0x359   : > { %1237 = vmax.xlane.f32.xlu1 %v1236_v56  ;;  %v1103_v57 = vpop.f32.mrf.mxu0 }
 0x35a   : > { %v1109_v58 = vsel %vm794_vm2, %v1103_v57, -inf }
 0x35b   : > { %1110 = vmax.xlane.f32.xlu0 %v1109_v58 }
 0x361   : > { %862 = vadd.xlane.f32.xlu1 %v861_v63  ;;  %v1233_v0 = vpop.f32.mrf.mxu0 }
 0x362   : > { %v1239_v1 = vsel %vm794_vm2, %v1233_v0, -inf }
 0x363   : > { %1240 = vmax.xlane.f32.xlu2 %v1239_v1 }
 0x369   : > { %1119 = vadd.xlane.f32.xlu1 %v1118_v4  ;;  %v1344_v4 = vld [vmem:[%s2510_s23 + $0x10] sm:$0xff] }
 0x36f   : > { %1978 = vrot.lane.b32.xlu0 %v1977_v6, %s2286_s26  ;;  %v1342_v6 = vld [vmem:[%s2510_s23] sm:$0xff] }
 0x371   : > { %992 = vadd.xlane.f32.xlu1 %v991_v7 }
 0x377   : > { %1258 = vrot.lane.b32.xlu0 %v2555_v13, %s2287_s25 }
 0x37b   : > { %894 = vrot.lane.b32.xlu2 %v2560_v15, %s2278_s15  ;;  %s2794_s15 = scalar_lea.vmem %s2746_s6, %s2497_s24 }
 0x383   : > { %1128 = vrot.lane.b32.xlu2 %v2555_v13, %s2288_s0 }
 0x3c4   : > { %v978_v8 = vpop.xlane.xlu1 %977 }
 0x3c5   : > { %v982_v11 = vsub.f32 %v945_v50, %v978_v8 }
 0x3c7   : > { %v984_v12 = vmul.f32 1.442695, %v982_v11 }
 0x3c9   : > { %2000 = vpow2.f32 %v984_v12 }
 0x3cc   : > { %v1238_v14 = vpop.xlane.xlu1 %1237 }
 0x3cd   : > { %v1242_v16 = vsub.f32 %v1205_v54, %v1238_v14 }
 0x3ce   : > { %v1111_v17 = vpop.xlane.xlu0 %1110 }
 0x3cf   : > { %v2001_v18 = vpop.eup %2000  ;;  %v1244_v19 = vmul.f32 1.442695, %v1242_v16  ;;  %v1113_v20 = vsub.f32 %v1103_v57, %v1111_v17 }
 0x3d0   : > { %v988_v21 = vsel %vm794_vm2, %v2001_v18, 0.0 }
 0x3d1   : > { %2002 = vpow2.f32 %v1244_v19  ;;  %989 = vadd.xlane.f32.xlu0 %v988_v21  ;;  %v1116_v22 = vmul.f32 1.442695, %v1113_v20 }
 0x3d4   : > { %v863_v23 = vpop.xlane.xlu1 %862 }
 0x3d5   : > { %2004 = vrcp.f32 %v863_v23 }
 0x3d6   : > { %v1241_v24 = vpop.xlane.xlu2 %1240  ;;  %2006 = vpow2.f32 %v1116_v22 }
 0x3d7   : > { %v2003_v25 = vpop.eup %2002  ;;  %v1243_v13 = vsub.f32 %v1233_v0, %v1241_v24 }
 0x3d8   : > { %v1248_v26 = vsel %vm794_vm2, %v2003_v25, 0.0 }
 0x3d9   : > { %v1246_v27 = vmul.f32 1.442695, %v1243_v13  ;;  %1249 = vadd.xlane.f32.xlu1 %v1248_v26 }
 0x3db   : > { %v2005_v28 = vpop.eup %2004  ;;  %2008 = vpow2.f32 %v1246_v27 }
 0x3dc   : > { %v1120_v29 = vpop.xlane.xlu1 %1119  ;;  %v2007_v30 = vpop.eup %2006  ;;  %v867_v32 = vmul.f32 %v2005_v28, %v1995_v61 }
 0x3dd   : > { %v1121_v33 = vsel %vm794_vm2, %v2007_v30, 0.0 }
 0x3de   : > { %v895_v31 = vpop.permute.xlu2 %894 }
 0x3df   : > { %915 = vmatpush.msra.mxu3 %v895_v31 }
 0x3e0   : > { %1832 = vmatmul.msk.f32.vlgmr.msra.gmra.mxu3 %vm794_vm2, %v867_v32 }
 0x3e1   : > { %v2009_v34 = vpop.eup %2008  ;;  %1122 = vadd.xlane.f32.xlu1 %v1121_v33  ;;  %v1979_v35 = vpop.permute.xlu0 %1978 }
 0x3e2   : > { %v1981_v36 = vunpack.i.h.bf16 %v1979_v35  ;;  %v1251_v37 = vsel %vm794_vm2, %v2009_v34, 0.0  ;;  %v1980_v38 = vunpack.i.l.bf16 %v1979_v35 }
 0x3e3   : > { %1252 = vadd.xlane.f32.xlu2 %v1251_v37 }
 0x3e4   : > { %v993_v39 = vpop.xlane.xlu1 %992  ;;  %1019 = vmatpush.msrb.mxu3 %v1980_v38  ;;  %1045 = vmatpush.msrb.mxu1 %v1981_v36 }
 0x3e5   : > { %2010 = vrcp.f32 %v993_v39  ;;  %1284 = vrot.lane.b32.xlu0 %v2560_v15, %s2287_s25 }
 0x3e6   : > { %v1129_v40 = vpop.permute.xlu2 %1128 }
 0x3e7   : > { %1149 = vmatpush.msra.mxu3 %v1129_v40 }
 0x3e9   : > { %v1259_v43 = vpop.permute.xlu0 %1258 }
 0x3eb   : > { %v2011_v41 = vpop.eup %2010 }
 0x3ec   : > { %v997_v42 = vmul.f32 %v2011_v41, %v1999_v5  ;;  %v1343_v5 = vld [vmem:[%s2510_s23 + $0x8] sm:$0xff] }
 0x3ee   : > { %1838 = vmatmul.msk.f32.vlgmr.msrb.gmra.mxu1 %vm794_vm2, %v997_v42 }
 0x3fa   : > { %1154 = vrot.lane.b32.xlu1 %v2560_v15, %s2288_s0 }
 0x444   : > { %v990_v44 = vpop.xlane.xlu0 %989 }
 0x445   : > { %2012 = vrcp.f32 %v990_v44 }
 0x446   : > { %2014 = vrcp.f32 %v1120_v29 }
 0x44b   : > { %v2013_v45 = vpop.eup %2012 }
 0x44c   : > { %v996_v46 = vmul.f32 %v2013_v45, %v2001_v18  ;;  %v1250_v48 = vpop.xlane.xlu1 %1249  ;;  %v2015_v49 = vpop.eup %2014  ;;  %v1447_v45 = vld [vmem:[%s2519_s12 + $0x18] sm:$0xff] }
 0x44d   : > { %2016 = vrcp.f32 %v1250_v48  ;;  %v1126_v50 = vmul.f32 %v2015_v49, %v2612_v3  ;;  %v1345_v3 = vld [vmem:[%s2510_s23 + $0x18] sm:$0xff]  ;;  %s2793_s23 = scalar_lea.vmem [#allocation8], %s2488_s7  ;;  %1470 = vmatpush.msrb.mxu0 %v1447_v45  ;;  %v1445_v48 = vld [vmem:[%s2519_s12 + $0x8] sm:$0xff]  ;;  %v1444_v49 = vld [vmem:[%s2519_s12] sm:$0xff] }
 0x44e   : > { %1837 = vmatmul.msk.f32.vlgmr.msrb.gmra.mxu3 %vm794_vm2, %v996_v46  ;;  %1368 = vmatpush.msra.mxu2 %v1345_v3  ;;  %v1983_v23 = vld [vmem:[%s2793_s23] ss:$0 sm:$0xff]  ;;  %v1446_v46 = vld [vmem:[%s2519_s12 + $0x10] sm:$0xff] }
 0x44f   : > { %1279 = vmatpush.msrb.mxu3 %v1259_v43  ;;  %1471 = vmatpush.msrb.mxu0 %v1446_v46 }
 0x450   : > { %1369 = vmatpush.msra.mxu2 %v1344_v4 }
 0x451   : > { %1472 = vmatpush.msrb.mxu0 %v1445_v48 }
 0x452   : > { %1370 = vmatpush.msra.mxu2 %v1343_v5  ;;  %v1985_v5 = vld [vmem:[%s610_s27] ss:$0 sm:$0xff] }
 0x453   : > { %v2017_v51 = vpop.eup %2016  ;;  %1473 = vmatpush.msrb.mxu0 %v1444_v49 }
 0x454   : > { %v1256_v52 = vmul.f32 %v2017_v51, %v2003_v25  ;;  %v1123_v15 = vpop.xlane.xlu1 %1122  ;;  %1371 = vmatpush.msra.mxu2 %v1342_v6 }
 0x455   : > { %2018 = vrcp.f32 %v1123_v15 }
 0x456   : > { %1843 = vmatmul.msk.f32.vlgmr.msra.gmra.mxu3 %vm794_vm2, %v1126_v50  ;;  %v1253_v53 = vpop.xlane.xlu2 %1252 }
 0x457   : > { %2020 = vrcp.f32 %v1253_v53  ;;  %v1285_v58 = vpop.permute.xlu0 %1284 }
 0x45b   : > { %v2019_v54 = vpop.eup %2018 }
 0x45c   : > { %v1127_v56 = vmul.f32 %v2019_v54, %v2007_v30  ;;  %v2292_v30 = vmov 32.0  }
 0x45d   : > { %v2021_v59 = vpop.eup %2020  ;;  %2022 = vrcp.f32 %v2292_v30  ;;  %v1987_v30 = vld [vmem:[%s734_s14] ss:$0 sm:$0xff] }
 0x45e   : > { %1849 = vmatmul.msk.f32.vlgmr.msrb.gmra.mxu3 %vm794_vm2, %v1256_v52  ;;  %v1257_v60 = vmul.f32 %v2021_v59, %v2009_v34 }
 0x463   : > { %v917_v61 = vpop.f32.mrf.mxu3  ;;  %v2023_v31 = vpop.eup %2022 }
 0x464   : > { %v1390_v32 = vmul.f32 32.0, %v2023_v31  ;;  %vm1394_vm5 = vweird.f32 %v2023_v31 }
 0x466   : > { %v1391_v33 = vsub.f32 1.0, %v1390_v32 }
 0x468   : > { %v1392_v34 = vmul.f32 %v2023_v31, %v1391_v33 }
 0x46a   : > { %v1393_v35 = vadd.f32 %v2023_v31, %v1392_v34 }
 0x46b   : > { %v1047_v55 = vpop.f32.mrf.mxu1 }
 0x46c   : > { %v1155_v57 = vpop.permute.xlu1 %1154  ;;  %1314 = vrot.lane.b32.xlu1 %v1047_v55, %s2289_s9  ;;  %v1490_v55 = vld [vmem:[%s2529_s21 + $0x38] sm:$0xff] }
 0x46d   : > { %1175 = vmatpush.msra.mxu1 %v1155_v57  ;;  %1510 = vmatpush.msra.mxu3 %v1490_v55 }
 0x46e   : > { %1844 = vmatmul.msk.f32.vlgmr.msra.gmra.mxu1 %vm794_vm2, %v1127_v56  ;;  %v1489_v56 = vld [vmem:[%s2529_s21 + $0x30] sm:$0xff] }
 0x46f   : > { %1305 = vmatpush.msrb.mxu1 %v1285_v58  ;;  %v1488_v58 = vld [vmem:[%s2529_s21 + $0x28] sm:$0xff]  ;;  %1511 = vmatpush.msra.mxu3 %v1489_v56 }
 0x471   : > { %1512 = vmatpush.msra.mxu3 %v1488_v58 }
 0x476   : > { %1850 = vmatmul.msk.f32.vlgmr.msrb.gmra.mxu1 %vm794_vm2, %v1257_v60 }
 0x4d1   : > { %v1021_v62 = vpop.f32.mrf.mxu3 }
 0x4d2   : > { %1312 = vrot.lane.b32.xlu0 %v1021_v62, %s2289_s9  ;;  %v1487_v62 = vld [vmem:[%s2529_s21 + $0x20] sm:$0xff] }
 0x4d3   : > { %1513 = vmatpush.msra.mxu3 %v1487_v62  ;;  %v1989_v62 = vld [vmem:[%s619_s5] ss:$0 sm:$0xff] }
 0x4d9   : > { %v1151_v63 = vpop.f32.mrf.mxu3 }
 0x4da   : > { %1320 = vrot.lane.b32.xlu0 %v1151_v63, %s2290_s2 }
 0x4de   : > { %v1315_v17 = vpop.permute.xlu1 %1314 }
 0x4df   : > { %v1335_v19 = vsel %vm794_vm2, %v917_v61, %v1315_v17 }
 0x4e1   : > { %v1281_v0 = vpop.f32.mrf.mxu3 }
 0x4e2   : > { %1328 = vrot.lane.b32.xlu0 %v1281_v0, %s2291_s4  ;;  %v1984_v0 = vld [vmem:[%s2794_s15] ss:$0 sm:$0xff] }
 0x4eb   : > { %v1177_v1 = vpop.f32.mrf.mxu1 }
 0x4ec   : > { %1322 = vrot.lane.b32.xlu0 %v1177_v1, %s2290_s2 }
 0x4f3   : > { %v1307_v2 = vpop.f32.mrf.mxu1 }
 0x4f4   : > { %1330 = vrot.lane.b32.xlu1 %v1307_v2, %s2291_s4  ;;  %v1486_v2 = vld [vmem:[%s2529_s21 + $0x18] sm:$0xff] }
 0x4f5   : > { %1514 = vmatpush.msra.mxu3 %v1486_v2 }
 0x544   : > { %v1313_v7 = vpop.permute.xlu0 %1312 }
 0x545   : > { %v1334_v11 = vsel %vm794_vm2, %v2605_v47, %v1313_v7 }
 0x54c   : > { %v1321_v8 = vpop.permute.xlu0 %1320 }
 0x54d   : > { %v1337_v12 = vsel %vm1336_vm3, %v1334_v11, %v1321_v8 }
 0x554   : > { %v1329_v14 = vpop.permute.xlu0 %1328 }
 0x555   : > { %v1340_v16 = vsel %vm1339_vm4, %v1337_v12, %v1329_v14 }
 0x556   : > { %1851 = vmatmul.msk.f32.vlgmr.msra.gmra.mxu2 %vm761_vm1, %v1340_v16 }
 0x55e   : > { %v1323_v18 = vpop.permute.xlu0 %1322 }
 0x55f   : > { %v1338_v20 = vsel %vm1336_vm3, %v1335_v19, %v1323_v18 }
 0x566   : > { %v1331_v21 = vpop.permute.xlu1 %1330 }
 0x567   : > { %v1341_v22 = vsel %vm1339_vm4, %v1338_v20, %v1331_v21 }
 0x568   : > { %1852 = vmatmul.msk.f32.gmra.mxu2 %vm761_vm1, %v1341_v22  ;;  %v1485_v22 = vld [vmem:[%s2529_s21 + $0x10] sm:$0xff] }
 0x569   : > { %1515 = vmatpush.msra.mxu3 %v1485_v22 }
 0x5d9   : > { %v1373_v24 = vpop.f32.mrf.mxu2 }
 0x5da   : > { %v1374_v25 = vadd.f32 %v1983_v23, %v1373_v24  ;;  %v1483_v24 = vld [vmem:[%s2529_s21] sm:$0xff] }
 0x5dc   : > { %v1379_v47 = vadd.f32 %v1374_v25, %v2542_v9  ;;  %v2658_v9 = vsel %vm1394_vm5, %v2023_v31, %v1393_v35  ;;  %v1986_v25 = vld [vmem:[%s726_s1] ss:$0 sm:$0xff] }
 0x5de   : > { %v1383_v13 = vsel %vm761_vm1, %v1379_v47, 0.0 }
 0x5df   : > { %1384 = vadd.xlane.f32.xlu2 %v1383_v13 }
 0x5eb   : > { %v1376_v26 = vpop.f32.mrf.mxu2 }
 0x5ec   : > { %v1377_v27 = vadd.f32 %v1983_v23, %v1376_v26  ;;  %v1484_v23 = vld [vmem:[%s2529_s21 + $0x8] sm:$0xff] }
 0x5ed   : > { %1516 = vmatpush.msra.mxu3 %v1484_v23 }
 0x5ee   : > { %v1380_v28 = vadd.f32 %v1377_v27, %v2546_v10 }
 0x5ef   : > { %1517 = vmatpush.msra.mxu3 %v1483_v24 }
 0x5f0   : > { %v1386_v29 = vsel %vm761_vm1, %v1380_v28, 0.0 }
 0x5f1   : > { %1387 = vadd.xlane.f32.xlu0 %v1386_v29 }
 0x652   : > { %v1385_v36 = vpop.xlane.xlu2 %1384 }
 0x653   : > { %v1396_v37 = vmul.f32 %v2658_v9, %v1385_v36 }
 0x655   : > { %v1398_v10 = vsub.f32 %v1379_v47, %v1396_v37 }
 0x657   : > { %v1400_v38 = vmul.f32 %v1398_v10, %v1398_v10 }
 0x659   : > { %v1402_v39 = vsel %vm761_vm1, %v1400_v38, 0.0 }
 0x65a   : > { %1403 = vadd.xlane.f32.xlu1 %v1402_v39 }
 0x664   : > { %v1388_v40 = vpop.xlane.xlu0 %1387 }
 0x665   : > { %v1397_v41 = vmul.f32 %v2658_v9, %v1388_v40 }
 0x667   : > { %v1399_v42 = vsub.f32 %v1380_v28, %v1397_v41 }
 0x669   : > { %v1401_v43 = vmul.f32 %v1399_v42, %v1399_v42 }
 0x66b   : > { %v1405_v44 = vsel %vm761_vm1, %v1401_v43, 0.0 }
 0x66c   : > { %1406 = vadd.xlane.f32.xlu2 %v1405_v44 }
 0x6cd   : > { %v1404_v50 = vpop.xlane.xlu1 %1403 }
 0x6ce   : > { %v1408_v51 = vmul.f32 %v1404_v50, %v2658_v9 }
 0x6d0   : > { %v1410_v52 = vadd.f32 1e-05, %v1408_v51 }
 0x6d2   : > { %2024 = vrsqrt.f32 %v1410_v52  ;;  %vm1418_vm7 = vweird.f32 %v1410_v52 }
 0x6d8   : > { %v2025_v15 = vpop.eup %2024 }
 0x6d9   : > { %v1413_v53 = vmul.f32 %v2025_v15, %v1410_v52  ;;  %vm1419_vm6 = vweird.f32 %v2025_v15 }
 0x6da   : > { %vm1420_vm8 = vmor %vm1418_vm7, %vm1419_vm6 }
 0x6db   : > { %v1414_v54 = vmul.f32 %v2025_v15, %v1413_v53 }
 0x6dd   : > { %v1415_v57 = vmul.f32 0.5, %v1414_v54 }
 0x6df   : > { %v1416_v59 = vsub.f32 1.5, %v1415_v57  ;;  %v1407_v60 = vpop.xlane.xlu2 %1406 }
 0x6e0   : > { %v1409_v61 = vmul.f32 %v1407_v60, %v2658_v9 }
 0x6e1   : > { %v1417_v63 = vmul.f32 %v2025_v15, %v1416_v59  ;;  %v1988_v59 = vld [vmem:[%s737_s10] ss:$0 sm:$0xff] }
 0x6e2   : > { %v1411_v1 = vadd.f32 1e-05, %v1409_v61 }
 0x6e3   : > { %v1421_v3 = vsel %vm1420_vm8, %v2025_v15, %v1417_v63 }
 0x6e4   : > { %v1432_v4 = vmul.f32 %v1421_v3, %v1398_v10  ;;  %2026 = vrsqrt.f32 %v1411_v1  ;;  %vm1428_vm10 = vweird.f32 %v1411_v1 }
 0x6e6   : > { %v1437_v6 = vmul.f32 %v1984_v0, %v1432_v4 }
 0x6e8   : > { %v1442_v7 = vadd.f32 %v1985_v5, %v1437_v6 }
 0x6ea   : > { %v2027_v8 = vpop.eup %2026  ;;  %1853 = vmatmul.msk.f32.vlgmr.msrb.gmra.mxu0 %vm761_vm1, %v1442_v7 }
 0x6eb   : > { %v1423_v11 = vmul.f32 %v2027_v8, %v1411_v1  ;;  %vm1429_vm9 = vweird.f32 %v2027_v8 }
 0x6ec   : > { %vm1430_vm11 = vmor %vm1428_vm10, %vm1429_vm9 }
 0x6ed   : > { %v1424_v12 = vmul.f32 %v2027_v8, %v1423_v11 }
 0x6ef   : > { %v1425_v14 = vmul.f32 0.5, %v1424_v12 }
 0x6f1   : > { %v1426_v16 = vsub.f32 1.5, %v1425_v14 }
 0x6f3   : > { %v1427_v17 = vmul.f32 %v2027_v8, %v1426_v16 }
 0x6f5   : > { %v1431_v18 = vsel %vm1430_vm11, %v2027_v8, %v1427_v17 }
 0x6f6   : > { %v1433_v19 = vmul.f32 %v1431_v18, %v1399_v42 }
 0x6f8   : > { %v1438_v20 = vmul.f32 %v1984_v0, %v1433_v19 }
 0x6fa   : > { %v1443_v21 = vadd.f32 %v1985_v5, %v1438_v20 }
 0x6fc   : > { %1854 = vmatmul.msk.f32.gmra.mxu0 %vm761_vm1, %v1443_v21 }
 0x767   : > { %v1475_v47 = vpop.f32.mrf.mxu0 }
 0x768   : > { %v1476_v13 = vadd.f32 %v1986_v25, %v1475_v47 }
 0x76a   : > { %v1481_v26 = vmax.f32 %v1476_v13, 0.0 }
 0x76c   : > { %1855 = vmatmul.msk.f32.vlgmr.msra.gmra.mxu3 %vm1495_vm12, %v1481_v26 }
 0x779   : > { %v1478_v27 = vpop.f32.mrf.mxu0 }
 0x77a   : > { %v1479_v28 = vadd.f32 %v1986_v25, %v1478_v27 }
 0x77c   : > { %v1482_v29 = vmax.f32 %v1479_v28, 0.0 }
 0x77e   : > { %1856 = vmatmul.msk.f32.gmra.mxu3 %vm1495_vm12, %v1482_v29 }
 0x7ef   : > { %v1519_v31 = vpop.f32.mrf.mxu3 }
 0x7f0   : > { %v1520_v32 = vadd.f32 %v1987_v30, %v1519_v31 }
 0x7f2   : > { %v1525_v33 = vadd.f32 %v1520_v32, %v1442_v7 }
 0x7f4   : > { %v1529_v34 = vsel %vm761_vm1, %v1525_v33, 0.0 }
 0x7f5   : > { %1530 = vadd.xlane.f32.xlu2 %v1529_v34 }
 0x801   : > { %v1522_v35 = vpop.f32.mrf.mxu3 }
 0x802   : > { %v1523_v36 = vadd.f32 %v1987_v30, %v1522_v35 }
 0x804   : > { %v1526_v37 = vadd.f32 %v1523_v36, %v1443_v21 }
 0x806   : > { %v1532_v10 = vsel %vm761_vm1, %v1526_v37, 0.0 }
 0x807   : > { %1533 = vadd.xlane.f32.xlu2 %v1532_v10 }
 0x868   : > { %v1531_v38 = vpop.xlane.xlu2 %1530 }
 0x869   : > { %v1535_v39 = vmul.f32 %v1531_v38, %v2658_v9 }
 0x86b   : > { %v1537_v40 = vsub.f32 %v1525_v33, %v1535_v39 }
 0x86d   : > { %v1539_v41 = vmul.f32 %v1537_v40, %v1537_v40 }
 0x86f   : > { %v1541_v42 = vsel %vm761_vm1, %v1539_v41, 0.0 }
 0x870   : > { %1542 = vadd.xlane.f32.xlu2 %v1541_v42 }
 0x87a   : > { %v1534_v43 = vpop.xlane.xlu2 %1533 }
 0x87b   : > { %v1536_v44 = vmul.f32 %v1534_v43, %v2658_v9 }
 0x87d   : > { %v1538_v45 = vsub.f32 %v1526_v37, %v1536_v44 }
 0x87f   : > { %v1540_v46 = vmul.f32 %v1538_v45, %v1538_v45 }
 0x881   : > { %v1544_v48 = vsel %vm761_vm1, %v1540_v46, 0.0 }
 0x882   : > { %1545 = vadd.xlane.f32.xlu2 %v1544_v48 }
 0x8e3   : > { %v1543_v49 = vpop.xlane.xlu2 %1542 }
 0x8e4   : > { %v1547_v50 = vmul.f32 %v1543_v49, %v2658_v9 }
 0x8e6   : > { %v1549_v51 = vadd.f32 1e-05, %v1547_v50 }
 0x8e8   : > { %2028 = vrsqrt.f32 %v1549_v51  ;;  %vm1557_vm14 = vweird.f32 %v1549_v51 }
 0x8ee   : > { %v2029_v52 = vpop.eup %2028 }
 0x8ef   : > { %v1552_v15 = vmul.f32 %v2029_v52, %v1549_v51  ;;  %vm1558_vm13 = vweird.f32 %v2029_v52 }
 0x8f0   : > { %vm1559_vm15 = vmor %vm1557_vm14, %vm1558_vm13 }
 0x8f1   : > { %v1553_v53 = vmul.f32 %v2029_v52, %v1552_v15 }
 0x8f3   : > { %v1554_v54 = vmul.f32 0.5, %v1553_v53 }
 0x8f5   : > { %v1555_v55 = vsub.f32 1.5, %v1554_v54  ;;  %v1546_v56 = vpop.xlane.xlu2 %1545 }
 0x8f6   : > { %v1548_v57 = vmul.f32 %v1546_v56, %v2658_v9 }
 0x8f7   : > { %v1556_v58 = vmul.f32 %v2029_v52, %v1555_v55 }
 0x8f8   : > { %v1550_v60 = vadd.f32 1e-05, %v1548_v57 }
 0x8f9   : > { %v1560_v61 = vsel %vm1559_vm15, %v2029_v52, %v1556_v58 }
 0x8fa   : > { %v1571_v63 = vmul.f32 %v1560_v61, %v1537_v40  ;;  %2030 = vrsqrt.f32 %v1550_v60  ;;  %vm1567_vm2 = vweird.f32 %v1550_v60 }
 0x8fc   : > { %v1576_v0 = vmul.f32 %v1988_v59, %v1571_v63 }
 0x8fe   : > { %v1581_v1 = vadd.f32 %v1989_v62, %v1576_v0 }
 0x900   : > { %v2031_v2 = vpop.eup %2030  ;;  %1583 = vst.msk [vmem:[#allocation2] sm:$0xff] %vm761_vm1, %v1581_v1 }
 0x901   : > { %v1562_v9 = vmul.f32 %v2031_v2, %v1550_v60  ;;  %vm1568_vm0 = vweird.f32 %v2031_v2 }
 0x902   : > { %vm1569_vm3 = vmor %vm1567_vm2, %vm1568_vm0 }
 0x903   : > { %v1563_v3 = vmul.f32 %v2031_v2, %v1562_v9 }
 0x905   : > { %v1564_v4 = vmul.f32 0.5, %v1563_v3 }
 0x907   : > { %v1565_v5 = vsub.f32 1.5, %v1564_v4 }
 0x909   : > { %v1566_v6 = vmul.f32 %v2031_v2, %v1565_v5 }
 0x90b   : > { %v1570_v7 = vsel %vm1569_vm3, %v2031_v2, %v1566_v6 }
 0x90c   : > { %v1572_v8 = vmul.f32 %v1570_v7, %v1538_v45 }
 0x90e   : > { %v1577_v11 = vmul.f32 %v1988_v59, %v1572_v8  ;;  %1588 = sbr.rel (%p1857_p3) target bundleno = 2325 (0x915), region = 104 }
 0x910   : > { %v1582_v12 = vadd.f32 %v1989_v62, %v1577_v11 }
 0x912   : > { %1584 = vst.msk [vmem:[#allocation2 + $0x8] sm:$0xff] %vm761_vm1, %v1582_v12 }
 0x913   : > { %1589 = vst.msk [vmem:[#allocation11] sm:$0xff] %vm761_vm1, %v1581_v1 }
 0x914   : > { %1590 = vst.msk [vmem:[#allocation11 + $0x8] sm:$0xff] %vm761_vm1, %v1582_v12 }
 0x915 PF: > { %p1906_p4 = scmp.eq.s32.totalorder %s2399_s19, 1  ;;  %s2798_s10 = sld [smem:[#allocation32_spill]] }
 0x916   : > { %s2293_s29 = smov [#allocation11]   ;;  %s2294_s26 = smov 128  }
 0x917   : > { %s1599_s22 = sshll.u32 %s2293_s29, 4  ;;  %s1600_s22 = int_to_ptr.vmem [resolvable:$true] %s1599_s22 }
 0x91b   : > { %s1601_s5 = sshll.u32 %s2798_s10, 4  ;;  %s1602_s5 = int_to_ptr.hbm [resolvable:$true] %s1601_s5 }
 0x91c   : > { %1881 = dma.vmem_to_hbm [thread:$0]  (%p1906_p4), %s1600_s22, 256, %s1602_s5, [#allocation5], %s2294_s26, %s2294_s26, %s2289_s9  }
 0x91d   : > { %2247 = dma.done.wait (%p1906_p4), [#allocation5], 256  }
 0x91e   : > { %2249 = vsyncadd (%p1906_p4), [#allocation5], 4294967040 }
 0x91f PF: > { %s27_s18 = sadd.s32 1, %s2272_s18   ;;  %s2799_s16 = sld [smem:[#allocation16_spill]] }
 0x920   : > { %p24_p5 = scmp.ge.s32.totalorder %s27_s18, 4   ;;  %s2800_s15 = sld [smem:[#allocation19_spill]] }
 0x921   : > { %s2801_s19 = sld [smem:[#allocation17_spill]]  ;;  %s2803_s29 = smov %s2256_s30 }
 0x922   : > { %s2802_s17 = sld [smem:[#allocation18_spill]] }
 0x923   :  { %26 = sbr.rel (!%p24_p5) target bundleno = 19 (0x13), region = 179 }
 0x925   : > { %s2804_s30 = smov %s2799_s16 }
 0x927   : > { %s2805_s16 = smov %s2801_s19 }
 0x928   :  { %1618 = vsyncpa [#allocation4], 1 }
 0x929   :  { %1620 = vsyncpa [#allocation4 + $0x1], 1 }
 0x92a   :  { %1621 = vsyncpa [#allocation7], 1 }
 0x92b   :  { %1622 = vsyncpa [#allocation5], 1 }
 0x92c   :  { %1624 = vsyncpa [#allocation5 + $0x1], 1 }

</bundles_post_ra>
